<compile_context>
chip_gen: v5e
topology: v5e:2x2
jax: 0.10.0
libtpu: 0.0.40
codegen_flags: <defaults>
</compile_context>

<pallas_src>
import functools

import numpy as np
import jax
import jax.numpy as jnp
from jax.experimental import pallas as pl
from jax.experimental.pallas import tpu as pltpu


# ---------------------------------------------------------------------------
# Fused kernel: one (batch, head) grid step.
#   x_ref    : (C, N)         channel-major input features (resident across the head axis)
#   wqkv_ref : (3*hd, C)      this head's q/k/v projection rows
#   bqkv_ref : (3*hd, 1)      this head's q/k/v projection bias
#   mask_ref : (N, N) bf16    rpb bias inside the KxK window, -1e30 outside (this head)
#   wproj_ref: (C, hd)        this head's slice of the output projection
#   bproj_ref: (C, 1)         output projection bias
#   o_ref    : (C, N)         channel-major output (written at the last head)
#   acc_ref  : (C, N) f32     VMEM accumulator for the per-head proj contributions
# ---------------------------------------------------------------------------
def _fused_nat_kernel(x_ref, wqkv_ref, bqkv_ref, mask_ref, wproj_ref, bproj_ref,
                      o_ref, acc_ref, *, head_dim, scale):
    h = pl.program_id(1)

    @pl.when(h == 0)
    def _init():
        acc_ref[...] = jnp.zeros_like(acc_ref)

    # per-head qkv projection on the MXU: (3*hd, C) @ (C, N) -> (3*hd, N), f32
    qkv = jnp.dot(wqkv_ref[...], x_ref[...],
                  preferred_element_type=jnp.float32) + bqkv_ref[...]
    q = (qkv[0:head_dim, :] * scale).astype(jnp.bfloat16)          # (hd, N)
    k = qkv[head_dim:2 * head_dim, :].astype(jnp.bfloat16)          # (hd, N)
    v = qkv[2 * head_dim:3 * head_dim, :].astype(jnp.bfloat16)      # (hd, N)

    # scores S[q, k] = sum_d q[d, q] * k[d, k]  -- bf16 operands, f32 accumulation
    s = jax.lax.dot_general(q, k, (((0,), (0,)), ((), ())),
                            preferred_element_type=jnp.float32)     # (Nq, Nk)
    s = s + mask_ref[...].astype(jnp.float32)                       # rpb + window mask

    # softmax over keys (lanes); every row has >= K*K valid keys so denom > 0
    m = jnp.max(s, axis=-1, keepdims=True)
    e = jnp.exp(s - m)
    denom = jnp.sum(e, axis=-1, keepdims=True)
    p = (e * pl.reciprocal(denom, approx=True)).astype(jnp.bfloat16)  # (Nq, Nk)

    # out_h[d, q] = sum_k v[d, k] * p[q, k]  -- bf16 operands, f32 accumulation
    out_h = jax.lax.dot_general(v, p, (((1,), (1,)), ((), ())),
                                preferred_element_type=jnp.float32)   # (hd, Nq)

    # fused output projection, accumulated over heads: (C, hd) @ (hd, N)
    acc_ref[...] += jnp.dot(wproj_ref[...], out_h,
                            preferred_element_type=jnp.float32)

    @pl.when(h == pl.num_programs(1) - 1)
    def _finalize():
        o_ref[...] = (acc_ref[...] + bproj_ref[...]).astype(o_ref.dtype)


# ---------------------------------------------------------------------------
# Dense additive mask: rpb[h, di+K-1, dj+K-1] inside the clamped KxK window, -1e30 outside.
# Built ONCE outside the jitted forward (depends only on rpb / K / padded H,W).
# ---------------------------------------------------------------------------
def build_neighborhood_bias(rpb, H, W, kernel_size, dilation=1, out_dtype=jnp.bfloat16):
    assert dilation == 1  # TODO(synk): dilation > 1 not implemented
    K = kernel_size
    window = K * dilation
    Hp, Wp = max(H, window), max(W, window)
    ns = K // 2

    def axis_tables(L):
        q = np.arange(L)
        start = np.clip(q - ns, 0, L - K)                                # window start per query
        a = np.arange(L)
        valid = (a[None, :] >= start[:, None]) & (a[None, :] < start[:, None] + K)
        rel = np.clip(a[None, :] - q[:, None] + (K - 1), 0, 2 * K - 2)   # rpb index
        return valid, rel

    rv, rr = axis_tables(Hp)
    cv, cr = axis_tables(Wp)
    valid = rv[:, None, :, None] & cv[None, :, None, :]                  # (Hp, Wp, Hp, Wp)
    bias = rpb[:, rr[:, None, :, None], cr[None, :, None, :]]            # (nh, Hp, Wp, Hp, Wp)
    bias = jnp.where(valid[None], bias, jnp.float32(-1e30))
    nh = rpb.shape[0]
    return bias.reshape(nh, Hp * Wp, Hp * Wp).astype(out_dtype)


# ---------------------------------------------------------------------------
# Parameters (deterministic synthetic init; same layouts as the PyTorch module:
# nn.Linear weights are (out_features, in_features)).
# ---------------------------------------------------------------------------
def make_params(key, dim, num_heads, kernel_size):
    k1, k2, k3, k4, k5 = jax.random.split(key, 5)
    return dict(
        qkv_w=0.02 * jax.random.normal(k1, (3 * dim, dim), jnp.float32),
        qkv_b=0.02 * jax.random.normal(k2, (3 * dim,), jnp.float32),
        proj_w=0.02 * jax.random.normal(k3, (dim, dim), jnp.float32),
        proj_b=0.02 * jax.random.normal(k4, (dim,), jnp.float32),
        rpb=0.02 * jax.random.truncated_normal(
            k5, -2.0, 2.0,
            (num_heads, 2 * kernel_size - 1, 2 * kernel_size - 1), jnp.float32),
    )


# ---------------------------------------------------------------------------
# Forward pass (NCHW in, NCHW out; semantics of NeighborhoodAttention2D.forward).
# `attn_bias` is the precomputed (nh, N, N) mask from build_neighborhood_bias.
# ---------------------------------------------------------------------------
def neighborhood_attention_2d(x, params, attn_bias, *, num_heads, kernel_size, dilation=1):
    assert dilation == 1  # TODO(synk): dilation > 1 not implemented
    B, C, H, W = x.shape
    head_dim = C // num_heads
    scale = head_dim ** -0.5
    window = kernel_size * dilation

    pad_h = max(0, window - H)
    pad_w = max(0, window - W)
    xc = x
    if pad_h or pad_w:
        # module zero-pads the features before the qkv projection; do the same in NCHW
        xc = jnp.pad(x, ((0, 0), (0, 0), (0, pad_h), (0, pad_w)))
    Hp, Wp = H + pad_h, W + pad_w
    N = Hp * Wp
    xc = xc.reshape(B, C, N)                                   # channel-major, spatial on lanes

    # per-head parameter slabs (tiny one-off reshapes; head-major feature ordering as in torch)
    wqkv = (params["qkv_w"].reshape(3, num_heads, head_dim, C)
            .transpose(1, 0, 2, 3).reshape(num_heads, 3 * head_dim, C))
    bqkv = (params["qkv_b"].reshape(3, num_heads, head_dim)
            .transpose(1, 0, 2).reshape(num_heads, 3 * head_dim, 1))
    wproj = params["proj_w"].reshape(C, num_heads, head_dim).transpose(1, 0, 2)   # (nh, C, hd)
    bproj = params["proj_b"].reshape(C, 1)

    kern = functools.partial(_fused_nat_kernel, head_dim=head_dim, scale=scale)

    flops = 2 * B * num_heads * (3 * head_dim * C * N        # qkv projection
                                 + 2 * head_dim * N * N      # Q.K^T and P.V
                                 + C * head_dim * N)         # output projection
    bytes_accessed = int(xc.size * 4 + attn_bias.size * attn_bias.dtype.itemsize
                         + B * C * N * 4
                         + (wqkv.size + bqkv.size + wproj.size + bproj.size) * 4)
    cost = pl.CostEstimate(flops=int(flops),
                           transcendentals=int(B * num_heads * N * N),
                           bytes_accessed=bytes_accessed)

    out = pl.pallas_call(
        kern,
        out_shape=jax.ShapeDtypeStruct((B, C, N), x.dtype),
        grid=(B, num_heads),
        in_specs=[
            pl.BlockSpec((None, C, N), lambda b, h: (b, 0, 0)),              # x (per batch)
            pl.BlockSpec((None, 3 * head_dim, C), lambda b, h: (h, 0, 0)),   # qkv W (per head)
            pl.BlockSpec((None, 3 * head_dim, 1), lambda b, h: (h, 0, 0)),   # qkv b (per head)
            pl.BlockSpec((None, N, N), lambda b, h: (h, 0, 0)),              # mask (per head)
            pl.BlockSpec((None, C, head_dim), lambda b, h: (h, 0, 0)),       # proj W (per head)
            pl.BlockSpec((C, 1), lambda b, h: (0, 0)),                       # proj b (constant)
        ],
        out_specs=pl.BlockSpec((None, C, N), lambda b, h: (b, 0, 0)),
        scratch_shapes=[pltpu.VMEM((C, N), jnp.float32)],
        compiler_params=pltpu.CompilerParams(
            dimension_semantics=("parallel", "arbitrary")),
        cost_estimate=cost,
    )(xc, wqkv, bqkv, attn_bias, wproj, bproj)

    # crop padding (proj is pointwise over spatial, so crop-after-proj == crop-before-proj)
    out = out.reshape(B, C, Hp, Wp)
    if pad_h or pad_w:
        out = out[:, :, :H, :W]
    return out, None, None


# ---------------------------------------------------------------------------
# Pure-JAX dense reference (same masked-softmax formulation) for a loose parity check.
# Valid for the no-padding case (H, W >= window).
# ---------------------------------------------------------------------------
def _reference_forward(x, params, *, num_heads, kernel_size):
    B, C, H, W = x.shape
    hd = C // num_heads
    scale = hd ** -0.5
    N = H * W
    xf = x.reshape(B, C, N)
    qkv = jnp.einsum("oc,bcn->bon", params["qkv_w"], xf) + params["qkv_b"][None, :, None]
    q = qkv[:, :C].reshape(B, num_heads, hd, N) * scale
    k = qkv[:, C:2 * C].reshape(B, num_heads, hd, N)
    v = qkv[:, 2 * C:].reshape(B, num_heads, hd, N)
    bias = build_neighborhood_bias(params["rpb"], H, W, kernel_size, out_dtype=jnp.float32)
    s = jnp.einsum("bhdq,bhdk->bhqk", q, k) + bias[None]
    p = jax.nn.softmax(s, axis=-1)
    o = jnp.einsum("bhqk,bhdk->bhdq", p, v).reshape(B, C, N)
    y = jnp.einsum("oc,bcn->bon", params["proj_w"], o) + params["proj_b"][None, :, None]
    return y.reshape(B, C, H, W)


if __name__ == "__main__":
    dim, num_heads, kernel_size = 32, 4, 3
    B, H, W = 2, 16, 16

    key = jax.random.PRNGKey(0)
    kx, kp = jax.random.split(key)
    x = jax.random.normal(kx, (B, dim, H, W), jnp.float32)
    params = make_params(kp, dim, num_heads, kernel_size)

    # mask precomputed once, off the jitted hot path (bf16 halves its DMA / VMEM footprint)
    attn_bias = jax.block_until_ready(
        build_neighborhood_bias(params["rpb"], H, W, kernel_size))

    fwd = jax.jit(functools.partial(
        neighborhood_attention_2d, num_heads=num_heads, kernel_size=kernel_size))
    y, _, _ = fwd(x, params, attn_bias)
    jax.block_until_ready(y)

    assert y.shape == (B, dim, H, W) and y.dtype == jnp.float32
    assert bool(jnp.all(jnp.isfinite(y)))

    # loose tolerance: bf16 MXU operands + approx reciprocal in the kernel
    y_ref = _reference_forward(x, params, num_heads=num_heads, kernel_size=kernel_size)
    np.testing.assert_allclose(np.asarray(y), np.asarray(y_ref), atol=1e-2, rtol=1e-1)

    print("KERNEL_OK")
</pallas_src>

<mosaic_0001>
module attributes {stable_mosaic.version = 11 : i64} {
  func.func @_fused_nat_kernel(%arg0: i32, %arg1: i32, %arg2: memref<1x32x256xf32, #tpu.memory_space<vmem>>, %arg3: memref<1x24x32xf32, #tpu.memory_space<vmem>>, %arg4: memref<1x24x1xf32, #tpu.memory_space<vmem>>, %arg5: memref<1x256x256xbf16, #tpu.memory_space<vmem>>, %arg6: memref<1x32x8xf32, #tpu.memory_space<vmem>>, %arg7: memref<32x1xf32, #tpu.memory_space<vmem>>, %arg8: memref<1x32x256xf32, #tpu.memory_space<vmem>>, %arg9: memref<32x256xf32, #tpu.memory_space<vmem>>) attributes {dimension_semantics = [#tpu.dimension_semantics<parallel>, #tpu.dimension_semantics<arbitrary>], iteration_bounds = array<i64: 2, 4>, scalar_prefetch = 0 : i64, scratch_operands = 1 : i64, tpu.core_type = #tpu.core_type<tc>, window_params = [{transform_indices = @transform_0, window_bounds = array<i64: 1, 32, 256>}, {transform_indices = @transform_1, window_bounds = array<i64: 1, 24, 32>}, {transform_indices = @transform_2, window_bounds = array<i64: 1, 24, 1>}, {transform_indices = @transform_3, window_bounds = array<i64: 1, 256, 256>}, {transform_indices = @transform_4, window_bounds = array<i64: 1, 32, 8>}, {pipeline_mode = #tpu.pipeline_mode<synchronous>, transform_indices = @transform_5, window_bounds = array<i64: 32, 1>}, {transform_indices = @transform_6, window_bounds = array<i64: 1, 32, 256>}]} {
    %c0_i32 = arith.constant 0 : i32
    %0 = arith.cmpi eq, %arg1, %c0_i32 : i32
    %1 = arith.extui %0 : i1 to i32
    %c0_i32_0 = arith.constant 0 : i32
    %2 = arith.cmpi ne, %1, %c0_i32_0 : i32
    scf.if %2 {
      %cst_26 = arith.constant 0.000000e+00 : f32
      %46 = vector.broadcast %cst_26 : f32 to vector<32x256xf32>
      %c0_27 = arith.constant 0 : index
      %c0_28 = arith.constant 0 : index
      %47 = vector.load %arg9[%c0_27, %c0_28] : memref<32x256xf32, #tpu.memory_space<vmem>>, vector<32x256xf32>
      tpu.vector_store %arg9[%c0_27, %c0_28], %46 {strides = array<i32>} : memref<32x256xf32, #tpu.memory_space<vmem>>, vector<32x256xf32>,
    } else {
    }
    %c0 = arith.constant 0 : index
    %c0_1 = arith.constant 0 : index
    %c0_2 = arith.constant 0 : index
    %3 = vector.load %arg3[%c0, %c0_1, %c0_2] : memref<1x24x32xf32, #tpu.memory_space<vmem>>, vector<1x24x32xf32>
    %4 = vector.shape_cast %3 : vector<1x24x32xf32> to vector<24x32xf32>
    %c0_3 = arith.constant 0 : index
    %c0_4 = arith.constant 0 : index
    %c0_5 = arith.constant 0 : index
    %5 = vector.load %arg2[%c0_3, %c0_4, %c0_5] : memref<1x32x256xf32, #tpu.memory_space<vmem>>, vector<1x32x256xf32>
    %6 = vector.shape_cast %5 : vector<1x32x256xf32> to vector<32x256xf32>
    %cst = arith.constant dense<0.000000e+00> : vector<24x256xf32>
    %7 = tpu.matmul %4, %6, %cst {dimension_numbers = #tpu.dot_dimension_numbers<[1], [0], [0], [1], [0, 0, 1, 1], [], []>} : vector<24x32xf32>, vector<32x256xf32>, vector<24x256xf32> -> vector<24x256xf32>
    %c0_6 = arith.constant 0 : index
    %c0_7 = arith.constant 0 : index
    %c0_8 = arith.constant 0 : index
    %8 = vector.load %arg4[%c0_6, %c0_7, %c0_8] : memref<1x24x1xf32, #tpu.memory_space<vmem>>, vector<1x24x1xf32>
    %9 = vector.shape_cast %8 : vector<1x24x1xf32> to vector<24x1xf32>
    %10 = vector.broadcast %9 : vector<24x1xf32> to vector<24x256xf32>
    %11 = arith.addf %7, %10 : vector<24x256xf32>
    %12 = vector.extract_strided_slice %11 {offsets = [0, 0], sizes = [8, 256], strides = [1, 1]} : vector<24x256xf32> to vector<8x256xf32>
    %cst_9 = arith.constant 0.353553385 : f32
    %13 = vector.broadcast %cst_9 : f32 to vector<8x256xf32>
    %14 = arith.mulf %12, %13 : vector<8x256xf32>
    %15 = arith.truncf %14 : vector<8x256xf32> to vector<8x256xbf16>
    %16 = vector.extract_strided_slice %11 {offsets = [8, 0], sizes = [8, 256], strides = [1, 1]} : vector<24x256xf32> to vector<8x256xf32>
    %17 = arith.truncf %16 : vector<8x256xf32> to vector<8x256xbf16>
    %18 = vector.extract_strided_slice %11 {offsets = [16, 0], sizes = [8, 256], strides = [1, 1]} : vector<24x256xf32> to vector<8x256xf32>
    %19 = arith.truncf %18 : vector<8x256xf32> to vector<8x256xbf16>
    %cst_10 = arith.constant dense<0.000000e+00> : vector<256x256xf32>
    %20 = tpu.matmul %15, %17, %cst_10 {dimension_numbers = #tpu.dot_dimension_numbers<[0], [0], [1], [1], [0, 1, 1, 1], [], []>} : vector<8x256xbf16>, vector<8x256xbf16>, vector<256x256xf32> -> vector<256x256xf32>
    %c0_11 = arith.constant 0 : index
    %c0_12 = arith.constant 0 : index
    %c0_13 = arith.constant 0 : index
    %21 = vector.load %arg5[%c0_11, %c0_12, %c0_13] : memref<1x256x256xbf16, #tpu.memory_space<vmem>>, vector<1x256x256xbf16>
    %22 = vector.shape_cast %21 : vector<1x256x256xbf16> to vector<256x256xbf16>
    %23 = arith.extf %22 : vector<256x256xbf16> to vector<256x256xf32>
    %24 = arith.addf %20, %23 : vector<256x256xf32>
    %cst_14 = arith.constant dense<0xFF800000> : vector<256xf32>
    %25 = vector.multi_reduction <maximumf>, %24, %cst_14 [1] : vector<256x256xf32> to vector<256xf32>
    %26 = vector.shape_cast %25 : vector<256xf32> to vector<256x1xf32>
    %27 = vector.broadcast %26 : vector<256x1xf32> to vector<256x256xf32>
    %28 = arith.subf %24, %27 : vector<256x256xf32>
    %29 = math.exp %28 : vector<256x256xf32>
    %cst_15 = arith.constant dense<0.000000e+00> : vector<256xf32>
    %30 = vector.multi_reduction <add>, %29, %cst_15 [1] : vector<256x256xf32> to vector<256xf32>
    %31 = vector.shape_cast %30 : vector<256xf32> to vector<256x1xf32>
    %32 = tpu.reciprocal %31 {approx = true} : vector<256x1xf32> -> vector<256x1xf32>
    %33 = vector.broadcast %32 : vector<256x1xf32> to vector<256x256xf32>
    %34 = arith.mulf %29, %33 : vector<256x256xf32>
    %35 = arith.truncf %34 : vector<256x256xf32> to vector<256x256xbf16>
    %cst_16 = arith.constant dense<0.000000e+00> : vector<8x256xf32>
    %36 = tpu.matmul %19, %35, %cst_16 {dimension_numbers = #tpu.dot_dimension_numbers<[1], [1], [0], [0], [0, 0, 1, 0], [], []>} : vector<8x256xbf16>, vector<256x256xbf16>, vector<8x256xf32> -> vector<8x256xf32>
    %c0_17 = arith.constant 0 : index
    %c0_18 = arith.constant 0 : index
    %37 = vector.load %arg9[%c0_17, %c0_18] : memref<32x256xf32, #tpu.memory_space<vmem>>, vector<32x256xf32>
    %c0_19 = arith.constant 0 : index
    %c0_20 = arith.constant 0 : index
    %c0_21 = arith.constant 0 : index
    %38 = vector.load %arg6[%c0_19, %c0_20, %c0_21] : memref<1x32x8xf32, #tpu.memory_space<vmem>>, vector<1x32x8xf32>
    %39 = vector.shape_cast %38 : vector<1x32x8xf32> to vector<32x8xf32>
    %cst_22 = arith.constant dense<0.000000e+00> : vector<32x256xf32>
    %40 = tpu.matmul %39, %36, %cst_22 {dimension_numbers = #tpu.dot_dimension_numbers<[1], [0], [0], [1], [0, 0, 1, 1], [], []>} : vector<32x8xf32>, vector<8x256xf32>, vector<32x256xf32> -> vector<32x256xf32>
    %41 = arith.addf %37, %40 : vector<32x256xf32>
    %c0_23 = arith.constant 0 : index
    %c0_24 = arith.constant 0 : index
    %42 = vector.load %arg9[%c0_23, %c0_24] : memref<32x256xf32, #tpu.memory_space<vmem>>, vector<32x256xf32>
    tpu.vector_store %arg9[%c0_23, %c0_24], %41 {strides = array<i32>} : memref<32x256xf32, #tpu.memory_space<vmem>>, vector<32x256xf32>,
    %c3_i32 = arith.constant 3 : i32
    %43 = arith.cmpi eq, %arg1, %c3_i32 : i32
    %44 = arith.extui %43 : i1 to i32
    %c0_i32_25 = arith.constant 0 : i32
    %45 = arith.cmpi ne, %44, %c0_i32_25 : i32
    scf.if %45 {
      %c0_26 = arith.constant 0 : index
      %c0_27 = arith.constant 0 : index
      %46 = vector.load %arg9[%c0_26, %c0_27] : memref<32x256xf32, #tpu.memory_space<vmem>>, vector<32x256xf32>
      %c0_28 = arith.constant 0 : index
      %c0_29 = arith.constant 0 : index
      %47 = vector.load %arg7[%c0_28, %c0_29] : memref<32x1xf32, #tpu.memory_space<vmem>>, vector<32x1xf32>
      %48 = vector.broadcast %47 : vector<32x1xf32> to vector<32x256xf32>
      %49 = arith.addf %46, %48 : vector<32x256xf32>
      %c0_30 = arith.constant 0 : index
      %c0_31 = arith.constant 0 : index
      %c0_32 = arith.constant 0 : index
      %50 = vector.load %arg8[%c0_30, %c0_31, %c0_32] : memref<1x32x256xf32, #tpu.memory_space<vmem>>, vector<1x32x256xf32>
      %51 = vector.shape_cast %50 : vector<1x32x256xf32> to vector<32x256xf32>
      %52 = vector.shape_cast %49 : vector<32x256xf32> to vector<1x32x256xf32>
      tpu.vector_store %arg8[%c0_30, %c0_31, %c0_32], %52 {strides = array<i32>} : memref<1x32x256xf32, #tpu.memory_space<vmem>>, vector<1x32x256xf32>,
    } else {
    }
    return
  }
  func.func @transform_0(%arg0: i32, %arg1: i32) -> (i32, i32, i32) {
    %c0_i32 = arith.constant 0 : i32
    %c0_i32_0 = arith.constant 0 : i32
    %c0_i32_1 = arith.constant 0 : i32
    return %arg0, %c0_i32, %c0_i32_0 : i32, i32, i32
  }
  func.func @transform_1(%arg0: i32, %arg1: i32) -> (i32, i32, i32) {
    %c0_i32 = arith.constant 0 : i32
    %c0_i32_0 = arith.constant 0 : i32
    %c0_i32_1 = arith.constant 0 : i32
    return %arg1, %c0_i32, %c0_i32_0 : i32, i32, i32
  }
  func.func @transform_2(%arg0: i32, %arg1: i32) -> (i32, i32, i32) {
    %c0_i32 = arith.constant 0 : i32
    %c0_i32_0 = arith.constant 0 : i32
    %c0_i32_1 = arith.constant 0 : i32
    return %arg1, %c0_i32, %c0_i32_0 : i32, i32, i32
  }
  func.func @transform_3(%arg0: i32, %arg1: i32) -> (i32, i32, i32) {
    %c0_i32 = arith.constant 0 : i32
    %c0_i32_0 = arith.constant 0 : i32
    %c0_i32_1 = arith.constant 0 : i32
    return %arg1, %c0_i32, %c0_i32_0 : i32, i32, i32
  }
  func.func @transform_4(%arg0: i32, %arg1: i32) -> (i32, i32, i32) {
    %c0_i32 = arith.constant 0 : i32
    %c0_i32_0 = arith.constant 0 : i32
    %c0_i32_1 = arith.constant 0 : i32
    return %arg1, %c0_i32, %c0_i32_0 : i32, i32, i32
  }
  func.func @transform_5(%arg0: i32, %arg1: i32) -> (i32, i32) {
    %c0_i32 = arith.constant 0 : i32
    %c0_i32_0 = arith.constant 0 : i32
    %c0_i32_1 = arith.constant 0 : i32
    return %c0_i32, %c0_i32_0 : i32, i32
  }
  func.func @transform_6(%arg0: i32, %arg1: i32) -> (i32, i32, i32) {
    %c0_i32 = arith.constant 0 : i32
    %c0_i32_0 = arith.constant 0 : i32
    %c0_i32_1 = arith.constant 0 : i32
    return %arg0, %c0_i32, %c0_i32_0 : i32, i32, i32
  }
}

</mosaic_0001>

<bundles_post_ra>
// kernel: neighborhood_attention_2d.1
= control target key start
LH: loop header
LB: loop body
LE: loop exit
PB: predicated region body
PF: predicated region fallthrough
CT: control target
= control target key end

     0   :  { %s2025_s21 = smov 0   ;;  %s2027_s22 = smov 0   ;;  %s2912_s0 = inlined_call_operand.vmem [shape: f32[2,32,256], index: 0, kind: input, shape index: {}]   ;;  %s2913_s1 = inlined_call_operand.vmem [shape: f32[4,24,32], index: 1, kind: input, shape index: {}]   ;;  %s2914_s2 = inlined_call_operand.vmem [shape: f32[4,24,1], index: 2, kind: input, shape index: {}]   ;;  %s2915_s3 = inlined_call_operand.vmem [shape: bf16[4,256,256], index: 3, kind: input, shape index: {}]   ;;  %s2916_s4 = inlined_call_operand.vmem [shape: f32[4,32,8], index: 4, kind: input, shape index: {}]   ;;  %s2917_s5 = inlined_call_operand.vmem [shape: f32[32,1], index: 5, kind: input, shape index: {}]   ;;  %s2918_s6 = inlined_call_operand.vmem [shape: f32[2,32,256], index: 6, kind: output, shape index: {}]  }
   0x1   :  { %2944 = sst [smem:[#allocation28_spill]] %s2912_s0  ;;  %s2029_s23 = smov 0  }
   0x2   :  { %s2031_s24 = smov 0   ;;  %s2033_s25 = smov 0  }
   0x3 LB: > { %s25_s26 = sadd.s32 1, %s1977_s23  ;;  %s28_s27 = sadd.s32 1, %s1981_s24  ;;  %s1985_s25 = sphi %s2033_s25, %s16_s25   ;;  %s1981_s24 = sphi %s2031_s24, %s3001_s24   ;;  %s1977_s23 = sphi %s2029_s23, %s3000_s23   ;;  %s1973_s22 = sphi %s2027_s22, %s2999_s22   ;;  %s1969_s21 = sphi %s2025_s21, %s2998_s21  }
   0x4   : > { %p26_p0 = scmp.ge.s32.totalorder %s25_s26, 4  ;;  %p1642_p1 = scmp.ge.s32.totalorder %s1985_s25, 1 }
   0x5   : > { %p264_p2 = scmp.lt.s32.totalorder %s1985_s25, 9 }
   0x6   : > { %s3003_s26 = smov (%p26_p0, %s25_s26), 0  ;;  %s3005_s27 = smov (!%p26_p0, %s28_s27), %s1981_s24 }
   0x7   : > { %p265_p3 = pnand %p1642_p1, %p264_p2  ;;  %p30_p4 = scmp.ge.s32.totalorder %s3005_s27, 2 }
   0x9   : > { %s3007_s27 = smov (%p30_p4, %s3005_s27), 0  ;;  %268 = sbr.rel (%p265_p3) target bundleno = 1549 (0x60d), region = 44 }
   0xe   : > { %p314_p5 = scmp.lt.s32.totalorder %s1973_s22, 1  ;;  %p319_p6 = scmp.lt.s32.totalorder %s1969_s21, 3 }
   0xf   : > { %s2945_s0 = sld [smem:[#allocation28_spill]]  ;;  %p1653_p7 = scmp.ne.s32.totalorder %s1969_s21, 0 }
  0x10   : > { %s3009_s22 = smov (!%p314_p5, %s1973_s22), 1 }
  0x11   : > { %s320_s28 = scalar_select %p319_p6, %s1969_s21, 3 }
  0x12   : > { %s1703_s29 = sshll.u32 %s3009_s22, 6 }
  0x13   : > { %s1707_s9 = smul.u32 24, %s320_s28  ;;  %s1704_s10 = sshll.u32 %s320_s28, 8 }
  0x14   : > { %s1705_s11 = sshll.u32 %s320_s28, 5  ;;  %s2077_s20 = scalar_lea.vmem %s2915_s3, %s1704_s10 }
  0x15   : > { %s2062_s8 = scalar_lea.vmem %s2945_s0, %s1703_s29  ;;  %s2067_s14 = scalar_lea.vmem %s2913_s1, %s1707_s9 }
  0x16   : > { %s2072_s17 = scalar_lea.vmem %s2914_s2, %s1707_s9  ;;  %s2082_s7 = scalar_lea.vmem %s2916_s4, %s1705_s11 }
  0x17   : > { %s2087_s12 = scalar_lea.vmem %s2918_s6, %s1703_s29  ;;  %348 = sbr.rel (%p1653_p7) target bundleno = 37 (0x25), region = 48 }
  0x1c   : > { %v1987_v0 = vmov 0.0  }
  0x1d   : > { %349 = vst [vmem:[#allocation2 + $0x30] sm:$0xff] %v1987_v0 }
  0x1e   : > { %350 = vst [vmem:[#allocation2] sm:$0xff] %v1987_v0 }
  0x1f   : > { %351 = vst [vmem:[#allocation2 + $0x18] sm:$0xff] %v1987_v0 }
  0x20   : > { %352 = vst [vmem:[#allocation2 + $0x10] sm:$0xff] %v1987_v0 }
  0x21   : > { %353 = vst [vmem:[#allocation2 + $0x8] sm:$0xff] %v1987_v0 }
  0x22   : > { %354 = vst [vmem:[#allocation2 + $0x20] sm:$0xff] %v1987_v0 }
  0x23   : > { %355 = vst [vmem:[#allocation2 + $0x28] sm:$0xff] %v1987_v0 }
  0x24   : > { %356 = vst [vmem:[#allocation2 + $0x38] sm:$0xff] %v1987_v0 }
  0x25 PF: > { %v366_v1 = vld [vmem:[%s2062_s8 + $0x30] sm:$0xff]  ;;  %v367_v2 = vld [vmem:[%s2062_s8 + $0x38] sm:$0xff]  ;;  %v364_v3 = vld [vmem:[%s2062_s8 + $0x20] sm:$0xff]  ;;  %v1988_v7 = vmov 0   ;;  %vm386_vm0 = vcmask 261120   ;;  %vm625_vm1 = vcmask 1043456  }
  0x26   : > { %408 = vmatpush.msra.mxu0 %v366_v1  ;;  %434 = vmatpush.msra.mxu1 %v367_v2  ;;  %v365_v4 = vld [vmem:[%s2062_s8 + $0x28] sm:$0xff]  ;;  %v362_v5 = vld [vmem:[%s2062_s8 + $0x10] sm:$0xff]  ;;  %v363_v6 = vld [vmem:[%s2062_s8 + $0x18] sm:$0xff]  ;;  %vm576_vm2 = vcmask 64512   ;;  %p1700_p8 = scmp.ne.s32.totalorder %s1969_s21, 3 }
  0x27   : > { %1751 = vset.pattern.permute.xlu0 %v1988_v7  ;;  %1752 = vset.pattern.permute.xlu2 %v1988_v7  ;;  %v368_v8 = vld [vmem:[%s2072_s17] sm:$0xff]  ;;  %v361_v10 = vld [vmem:[%s2062_s8 + $0x8] sm:$0xff] }
  0x28   : > { %409 = vmatpush.msra.mxu0 %v364_v3  ;;  %435 = vmatpush.msra.mxu1 %v365_v4  ;;  %v360_v9 = vld [vmem:[%s2062_s8] sm:$0xff]  ;;  %v369_v12 = vld [vmem:[%s2072_s17 + $0x8] sm:$0xff] }
  0x29   : > { %373 = vperm.xlu0 %1751, %v368_v8   ;;  %v357_v11 = vld [vmem:[%s2067_s14] sm:$0xff]  ;;  %v358_v13 = vld [vmem:[%s2067_s14 + $0x8] sm:$0xff] }
  0x2a   : > { %410 = vmatpush.msra.mxu0 %v362_v5  ;;  %436 = vmatpush.msra.mxu1 %v363_v6  ;;  %v468_v7 = vld [vmem:[%s2077_s20 + $0x60] sm:$0xff] }
  0x2b   : > { %v512_v8 = vunpack.c.l.bf16 %v468_v7 }
  0x2c   : > { %411 = vmatpush.msra.mxu0 %v360_v9  ;;  %437 = vmatpush.msra.mxu1 %v361_v10  ;;  %v513_v9 = vunpack.c.h.bf16 %v468_v7  ;;  %v466_v10 = vld [vmem:[%s2077_s20 + $0x50] sm:$0xff] }
  0x2d   : > { %1654 = vmatmul.msk.f32.vlgmr.msra.gmra.mxu0 %vm386_vm0, %v357_v11  ;;  %1657 = vmatmul.msk.f32.vlgmr.msra.gmra.mxu1 %vm386_vm0, %v357_v11 }
  0x31   : > { %378 = vperm.xlu0 %1751, %v369_v12  }
  0x35   : > { %1655 = vmatmul.msk.f32.gmra.mxu0 %vm386_vm0, %v358_v13  ;;  %1658 = vmatmul.msk.f32.gmra.mxu1 %vm386_vm0, %v358_v13 }
  0x9b   : > { %v374_v14 = vpop.permute.xlu0 %373 }
  0xa3   : > { %v379_v23 = vpop.permute.xlu0 %378 }
  0xaa   : > { %v413_v15 = vpop.f32.mrf.mxu0  ;;  %v439_v16 = vpop.f32.mrf.mxu1 }
  0xab   : > { %v414_v17 = vadd.f32 %v413_v15, %v374_v14  ;;  %v440_v18 = vadd.f32 %v439_v16, %v374_v14  ;;  %v469_v15 = vld [vmem:[%s2077_s20 + $0x68] sm:$0xff]  ;;  %v508_v16 = vunpack.c.l.bf16 %v466_v10 }
  0xad   : > { %v448_v19 = vmul.f32 0.35355338, %v414_v17  ;;  %v449_v20 = vmul.f32 0.35355338, %v440_v18  ;;  %v509_v17 = vunpack.c.h.bf16 %v466_v10  ;;  %v458_v10 = vld [vmem:[%s2077_s20 + $0x10] sm:$0xff] }
  0xaf   : > { %v450_v21 = vpack.c.bf16 %v448_v19, %v448_v19  ;;  %v451_v22 = vpack.c.bf16 %v449_v20, %v449_v20  ;;  %v514_v19 = vunpack.c.l.bf16 %v469_v15  ;;  %v515_v20 = vunpack.c.h.bf16 %v469_v15 }
  0xb1   : > { %552 = vxpose.binary.xlu1.c.b16.start.end [1/2] (short) %v451_v22, %v450_v21, 128  ;;  %v462_v21 = vld [vmem:[%s2077_s20 + $0x30] sm:$0xff] }
  0xb2   : > { %v416_v24 = vpop.f32.mrf.mxu0  ;;  %v442_v25 = vpop.f32.mrf.mxu1 }
  0xb3   : > { %v417_v26 = vadd.f32 %v416_v24, %v379_v23  ;;  %v443_v27 = vadd.f32 %v442_v25, %v379_v23  ;;  %v467_v24 = vld [vmem:[%s2077_s20 + $0x58] sm:$0xff] }
  0xb5   : > { %v452_v28 = vpack.c.bf16 %v417_v26, %v417_v26  ;;  %v453_v29 = vpack.c.bf16 %v443_v27, %v443_v27 }
  0xb7   : > { %v627_v30 = vsel %vm625_vm1, %v452_v28, 0  ;;  %v630_v31 = vsel %vm625_vm1, %v453_v29, 0  ;;  %v500_v29 = vunpack.c.l.bf16 %v462_v21 }
  0xb8   : > { %639 = vmatpush.bf16.msra.mxu2 %v627_v30  ;;  %728 = vmatpush.bf16.msra.mxu3 %v630_v31  ;;  %v501_v30 = vunpack.c.h.bf16 %v462_v21  ;;  %v470_v31 = vld [vmem:[%s2077_s20 + $0x70] sm:$0xff]  ;;  %v493_v21 = vunpack.c.h.bf16 %v458_v10 }
 0x15d   : > { %v560_v32 = vpop.trf.xlu1 }
 0x15e   : > { %1660 = vmatmul.msk.bf16.vlgmr.msra.gmra.mxu2 %vm576_vm2, %v560_v32  ;;  %1676 = vmatmul.msk.bf16.vlgmr.msra.gmra.mxu3 %vm576_vm2, %v560_v32  ;;  %v510_v32 = vunpack.c.l.bf16 %v467_v24 }
 0x165   : > { %v561_v33 = vpop.trf.xlu1 }
 0x16d   : > { %v562_v34 = vpop.trf.xlu1 }
 0x16e   : > { %1661 = vmatmul.msk.bf16.gmra.mxu2 %vm576_vm2, %v562_v34  ;;  %1677 = vmatmul.msk.bf16.gmra.mxu3 %vm576_vm2, %v562_v34 }
 0x175   : > { %v563_v35 = vpop.trf.xlu1 }
 0x17d   : > { %v564_v36 = vpop.trf.xlu1 }
 0x17e   : > { %1662 = vmatmul.msk.bf16.gmra.mxu2 %vm576_vm2, %v564_v36  ;;  %1678 = vmatmul.msk.bf16.gmra.mxu3 %vm576_vm2, %v564_v36  ;;  %v516_v36 = vunpack.c.l.bf16 %v470_v31 }
 0x185   : > { %v565_v37 = vpop.trf.xlu1 }
 0x18d   : > { %v566_v38 = vpop.trf.xlu1 }
 0x18e   : > { %1663 = vmatmul.msk.bf16.gmra.mxu2 %vm576_vm2, %v566_v38  ;;  %1679 = vmatmul.msk.bf16.gmra.mxu3 %vm576_vm2, %v566_v38 }
 0x195   : > { %v567_v39 = vpop.trf.xlu1 }
 0x19d   : > { %v568_v40 = vpop.trf.xlu1 }
 0x19e   : > { %1664 = vmatmul.msk.bf16.gmra.mxu2 %vm576_vm2, %v568_v40  ;;  %1680 = vmatmul.msk.bf16.gmra.mxu3 %vm576_vm2, %v568_v40 }
 0x1a5   : > { %v569_v41 = vpop.trf.xlu1 }
 0x1ad   : > { %v570_v42 = vpop.trf.xlu1 }
 0x1ae   : > { %1665 = vmatmul.msk.bf16.gmra.mxu2 %vm576_vm2, %v570_v42  ;;  %1681 = vmatmul.msk.bf16.gmra.mxu3 %vm576_vm2, %v570_v42  ;;  %v464_v42 = vld [vmem:[%s2077_s20 + $0x40] sm:$0xff] }
 0x1b5   : > { %v571_v43 = vpop.trf.xlu1 }
 0x1bd   : > { %v572_v44 = vpop.trf.xlu1 }
 0x1be   : > { %1666 = vmatmul.msk.bf16.gmra.mxu2 %vm576_vm2, %v572_v44  ;;  %1682 = vmatmul.msk.bf16.gmra.mxu3 %vm576_vm2, %v572_v44 }
 0x1c5   : > { %v573_v45 = vpop.trf.xlu1 }
 0x1cd   : > { %v574_v46 = vpop.trf.xlu1 }
 0x1ce   : > { %1667 = vmatmul.msk.bf16.gmra.mxu2 %vm576_vm2, %v574_v46  ;;  %1683 = vmatmul.msk.bf16.gmra.mxu3 %vm576_vm2, %v574_v46 }
 0x1d5   : > { %v575_v38 = vpop.trf.xlu1 }
 0x1de   : > { %1668 = vmatmul.msk.bf16.gmra.mxu2 %vm576_vm2, %v561_v33  ;;  %1684 = vmatmul.msk.bf16.gmra.mxu3 %vm576_vm2, %v561_v33  ;;  %v511_v33 = vunpack.c.h.bf16 %v467_v24 }
 0x1e1   : > { %v2124_v47 = vpop.f32.mrf.mxu2  ;;  %v2126_v48 = vpop.f32.mrf.mxu3 }
 0x1e9   : > { %v2128_v49 = vpop.f32.mrf.mxu2  ;;  %v2130_v50 = vpop.f32.mrf.mxu3 }
 0x1ee   : > { %1669 = vmatmul.msk.bf16.gmra.mxu2 %vm576_vm2, %v563_v35  ;;  %1685 = vmatmul.msk.bf16.gmra.mxu3 %vm576_vm2, %v563_v35 }
 0x1f1   : > { %v2134_v51 = vpop.f32.mrf.mxu2  ;;  %v2136_v52 = vpop.f32.mrf.mxu3 }
 0x1f9   : > { %v2138_v53 = vpop.f32.mrf.mxu2  ;;  %v2140_v54 = vpop.f32.mrf.mxu3 }
 0x1fe   : > { %1670 = vmatmul.msk.bf16.gmra.mxu2 %vm576_vm2, %v565_v37  ;;  %1686 = vmatmul.msk.bf16.gmra.mxu3 %vm576_vm2, %v565_v37  ;;  %v517_v37 = vunpack.c.h.bf16 %v470_v31  ;;  %v463_v31 = vld [vmem:[%s2077_s20 + $0x38] sm:$0xff] }
 0x201   : > { %v2144_v55 = vpop.f32.mrf.mxu2  ;;  %v2146_v56 = vpop.f32.mrf.mxu3 }
 0x209   : > { %v2148_v57 = vpop.f32.mrf.mxu2  ;;  %v2150_v58 = vpop.f32.mrf.mxu3 }
 0x20e   : > { %1671 = vmatmul.msk.bf16.gmra.mxu2 %vm576_vm2, %v567_v39  ;;  %1687 = vmatmul.msk.bf16.gmra.mxu3 %vm576_vm2, %v567_v39  ;;  %v460_v39 = vld [vmem:[%s2077_s20 + $0x20] sm:$0xff] }
 0x20f   : > { %v496_v7 = vunpack.c.l.bf16 %v460_v39 }
 0x211   : > { %v656_v59 = vpop.f32.mrf.mxu2  ;;  %v745_v60 = vpop.f32.mrf.mxu3 }
 0x212   : > { %v2199_v40 = vadd.f32 %v656_v59, %v500_v29  ;;  %v505_v59 = vunpack.c.h.bf16 %v464_v42 }
 0x219   : > { %v2154_v61 = vpop.f32.mrf.mxu2  ;;  %v2156_v62 = vpop.f32.mrf.mxu3 }
 0x21e   : > { %1672 = vmatmul.msk.bf16.gmra.mxu2 %vm576_vm2, %v569_v41  ;;  %1688 = vmatmul.msk.bf16.gmra.mxu3 %vm576_vm2, %v569_v41  ;;  %v2201_v41 = vadd.f32 %v745_v60, %v501_v30 }
 0x220   : > { %v828_v60 = vmax.f32 %v2199_v40, %v2201_v41 }
 0x221   : > { %v2160_v63 = vpop.f32.mrf.mxu2  ;;  %v2162_v0 = vpop.f32.mrf.mxu3 }
 0x229   : > { %v2164_v1 = vpop.f32.mrf.mxu2  ;;  %v2166_v2 = vpop.f32.mrf.mxu3 }
 0x22e   : > { %1673 = vmatmul.msk.bf16.gmra.mxu2 %vm576_vm2, %v571_v43  ;;  %1689 = vmatmul.msk.bf16.gmra.mxu3 %vm576_vm2, %v571_v43 }
 0x231   : > { %v666_v3 = vpop.f32.mrf.mxu2  ;;  %v755_v4 = vpop.f32.mrf.mxu3 }
 0x232   : > { %v2182_v22 = vadd.f32 %v666_v3, %v508_v16  ;;  %v2184_v23 = vadd.f32 %v755_v4, %v509_v17  ;;  %v2229_v16 = vadd.f32 %v2162_v0, %v505_v59  ;;  %v465_v17 = vld [vmem:[%s2077_s20 + $0x48] sm:$0xff]  ;;  %v456_v0 = vld [vmem:[%s2077_s20] sm:$0xff] }
 0x233   : > { %v506_v24 = vunpack.c.l.bf16 %v465_v17 }
 0x234   : > { %v840_v35 = vmax.f32 %v2182_v22, %v2184_v23 }
 0x235   : > { %v2248_v29 = vadd.f32 %v2164_v1, %v506_v24 }
 0x239   : > { %v668_v5 = vpop.f32.mrf.mxu2  ;;  %v757_v6 = vpop.f32.mrf.mxu3 }
 0x23a   : > { %v2204_v43 = vadd.f32 %v668_v5, %v510_v32  ;;  %v2206_v44 = vadd.f32 %v757_v6, %v511_v33 }
 0x23c   : > { %v843_v5 = vmax.f32 %v2204_v43, %v2206_v44 }
 0x23e   : > { %1674 = vmatmul.msk.bf16.gmra.mxu2 %vm576_vm2, %v573_v45  ;;  %1690 = vmatmul.msk.bf16.gmra.mxu3 %vm576_vm2, %v573_v45 }
 0x241   : > { %v671_v11 = vpop.f32.mrf.mxu2  ;;  %v760_v12 = vpop.f32.mrf.mxu3 }
 0x242   : > { %v2174_v13 = vadd.f32 %v671_v11, %v512_v8  ;;  %v2176_v14 = vadd.f32 %v760_v12, %v513_v9  ;;  %v497_v8 = vunpack.c.h.bf16 %v460_v39  ;;  %v504_v9 = vunpack.c.l.bf16 %v464_v42 }
 0x243   : > { %v2220_v11 = vadd.f32 %v2144_v55, %v496_v7  ;;  %v507_v55 = vunpack.c.h.bf16 %v465_v17  ;;  %v474_v17 = vld [vmem:[%s2077_s20 + $0x90] sm:$0xff] }
 0x244   : > { %v846_v18 = vmax.f32 %v2174_v13, %v2176_v14  ;;  %v2223_v12 = vadd.f32 %v2146_v56, %v497_v8  ;;  %v2226_v15 = vadd.f32 %v2160_v63, %v504_v9 }
 0x245   : > { %v2251_v30 = vadd.f32 %v2166_v2, %v507_v55 }
 0x246   : > { %847 = vmax.xlane.f32.xlu2 %v846_v18  ;;  %v822_v56 = vmax.f32 %v2220_v11, %v2223_v12  ;;  %v834_v63 = vmax.f32 %v2226_v15, %v2229_v16 }
 0x249   : > { %v673_v25 = vpop.f32.mrf.mxu2  ;;  %v762_v26 = vpop.f32.mrf.mxu3 }
 0x24a   : > { %v2187_v27 = vadd.f32 %v673_v25, %v514_v19  ;;  %v2189_v28 = vadd.f32 %v762_v26, %v515_v20  ;;  %v492_v20 = vunpack.c.l.bf16 %v458_v10  ;;  %v2245_v26 = vadd.f32 %v2136_v52, %v493_v21 }
 0x24b   : > { %v837_v52 = vmax.f32 %v2248_v29, %v2251_v30 }
 0x24c   : > { %v849_v34 = vmax.f32 %v2187_v27, %v2189_v28  ;;  %v2242_v25 = vadd.f32 %v2134_v51, %v492_v20 }
 0x24e   : > { %850 = vmax.xlane.f32.xlu0 %v849_v34  ;;  %841 = vmax.xlane.f32.xlu2 %v840_v35  ;;  %v488_v34 = vunpack.c.l.bf16 %v456_v0  ;;  %v489_v35 = vunpack.c.h.bf16 %v456_v0  ;;  %v816_v51 = vmax.f32 %v2242_v25, %v2245_v26 }
 0x24f   : > { %1675 = vmatmul.msk.bf16.gmra.mxu2 %vm576_vm2, %v575_v38  ;;  %1691 = vmatmul.msk.bf16.gmra.mxu3 %vm576_vm2, %v575_v38  ;;  %v461_v38 = vld [vmem:[%s2077_s20 + $0x28] sm:$0xff] }
 0x250   : > { %v2259_v1 = vadd.f32 %v2124_v47, %v488_v34  ;;  %v2262_v2 = vadd.f32 %v2126_v48, %v489_v35  ;;  %v498_v8 = vunpack.c.l.bf16 %v461_v38  ;;  %v499_v9 = vunpack.c.h.bf16 %v461_v38  ;;  %v457_v34 = vld [vmem:[%s2077_s20 + $0x8] sm:$0xff] }
 0x251   : > { %v676_v45 = vpop.f32.mrf.mxu2  ;;  %v765_v46 = vpop.f32.mrf.mxu3 }
 0x252   : > { %v2208_v3 = vadd.f32 %v676_v45, %v516_v36  ;;  %v2210_v4 = vadd.f32 %v765_v46, %v517_v37  ;;  %v502_v36 = vunpack.c.l.bf16 %v463_v31  ;;  %v503_v37 = vunpack.c.h.bf16 %v463_v31  ;;  %v472_v45 = vld [vmem:[%s2077_s20 + $0x80] sm:$0xff] }
 0x253   : > { %v810_v47 = vmax.f32 %v2259_v1, %v2262_v2  ;;  %v520_v48 = vunpack.c.l.bf16 %v472_v45  ;;  %v521_v59 = vunpack.c.h.bf16 %v472_v45 }
 0x254   : > { %v852_v6 = vmax.f32 %v2208_v3, %v2210_v4  ;;  %v2266_v39 = vadd.f32 %v2154_v61, %v502_v36  ;;  %v2269_v42 = vadd.f32 %v2156_v62, %v503_v37  ;;  %v459_v62 = vld [vmem:[%s2077_s20 + $0x18] sm:$0xff]  ;;  %v476_v37 = vld [vmem:[%s2077_s20 + $0xa0] sm:$0xff] }
 0x255   : > { %v494_v24 = vunpack.c.l.bf16 %v459_v62  ;;  %v495_v55 = vunpack.c.h.bf16 %v459_v62  ;;  %v529_v45 = vunpack.c.h.bf16 %v476_v37 }
 0x256   : > { %829 = vmax.xlane.f32.xlu0 %v828_v60  ;;  %844 = vmax.xlane.f32.xlu2 %v843_v5  ;;  %v831_v61 = vmax.f32 %v2266_v39, %v2269_v42  ;;  %v2282_v60 = vadd.f32 %v2148_v57, %v498_v8  ;;  %v2285_v5 = vadd.f32 %v2150_v58, %v499_v9  ;;  %v471_v9 = vld [vmem:[%s2077_s20 + $0x78] sm:$0xff] }
 0x257   : > { %853 = vmax.xlane.f32.xlu1 %v852_v6  ;;  %v2297_v0 = vadd.f32 %v2138_v53, %v494_v24  ;;  %v2300_v31 = vadd.f32 %v2140_v54, %v495_v55  ;;  %v528_v54 = vunpack.c.l.bf16 %v476_v37  ;;  %v473_v55 = vld [vmem:[%s2077_s20 + $0x88] sm:$0xff] }
 0x258   : > { %v825_v57 = vmax.f32 %v2282_v60, %v2285_v5 }
 0x259   : > { %v2232_v18 = vpop.f32.mrf.mxu2  ;;  %v2234_v19 = vpop.f32.mrf.mxu3  ;;  %v819_v38 = vmax.f32 %v2297_v0, %v2300_v31 }
 0x25e   : > { %823 = vmax.xlane.f32.xlu0 %v822_v56  ;;  %835 = vmax.xlane.f32.xlu2 %v834_v63  ;;  %v524_v56 = vunpack.c.l.bf16 %v474_v17  ;;  %v525_v63 = vunpack.c.h.bf16 %v474_v17  ;;  %v518_v17 = vunpack.c.l.bf16 %v471_v9 }
 0x261   : > { %v681_v32 = vpop.f32.mrf.mxu2  ;;  %v770_v33 = vpop.f32.mrf.mxu3 }
 0x262   : > { %v2287_v6 = vadd.f32 %v681_v32, %v520_v48  ;;  %v2289_v10 = vadd.f32 %v770_v33, %v521_v59 }
 0x264   : > { %2946 = vst [vmem:[#allocation3_spill] sm:$0xff] %v2287_v6  ;;  %v858_v58 = vmax.f32 %v2287_v6, %v2289_v10 }
 0x265   : > { %2947 = vst [vmem:[#allocation4_spill] sm:$0xff] %v2289_v10 }
 0x266   : > { %817 = vmax.xlane.f32.xlu0 %v816_v51  ;;  %838 = vmax.xlane.f32.xlu2 %v837_v52  ;;  %v490_v51 = vunpack.c.l.bf16 %v457_v34  ;;  %v491_v52 = vunpack.c.h.bf16 %v457_v34  ;;  %v523_v34 = vunpack.c.h.bf16 %v473_v55 }
 0x268   : > { %v2313_v8 = vadd.f32 %v2128_v49, %v490_v51 }
 0x269   : > { %v2272_v46 = vpop.f32.mrf.mxu2  ;;  %v2274_v7 = vpop.f32.mrf.mxu3 }
 0x26a   : > { %2950 = vst [vmem:[#allocation7_spill] sm:$0xff] %v2313_v8 }
 0x26e   : > { %811 = vmax.xlane.f32.xlu0 %v810_v47  ;;  %832 = vmax.xlane.f32.xlu2 %v831_v61  ;;  %v2316_v47 = vadd.f32 %v2130_v50, %v491_v52  ;;  %v2328_v50 = vadd.f32 %v2232_v18, %v518_v17  ;;  %v2341_v18 = vadd.f32 %v2274_v7, %v523_v34 }
 0x270   : > { %2951 = vst [vmem:[#allocation8_spill] sm:$0xff] %v2316_v47 }
 0x271   : > { %v686_v20 = vpop.f32.mrf.mxu2  ;;  %v775_v21 = vpop.f32.mrf.mxu3 }
 0x272   : > { %v2302_v32 = vadd.f32 %v686_v20, %v524_v56  ;;  %v2304_v33 = vadd.f32 %v775_v21, %v525_v63  ;;  %v519_v20 = vunpack.c.h.bf16 %v471_v9  ;;  %v813_v21 = vmax.f32 %v2313_v8, %v2316_v47  ;;  %v484_v47 = vld [vmem:[%s2077_s20 + $0xe0] sm:$0xff] }
 0x274   : > { %2948 = vst [vmem:[#allocation5_spill] sm:$0xff] %v2302_v32  ;;  %v864_v53 = vmax.f32 %v2302_v32, %v2304_v33  ;;  %v2331_v24 = vadd.f32 %v2234_v19, %v519_v20  ;;  %v475_v19 = vld [vmem:[%s2077_s20 + $0x98] sm:$0xff] }
 0x275   : > { %2949 = vst [vmem:[#allocation6_spill] sm:$0xff] %v2304_v33 }
 0x276   : > { %826 = vmax.xlane.f32.xlu2 %v825_v57  ;;  %859 = vmax.xlane.f32.xlu0 %v858_v58  ;;  %v478_v57 = vld [vmem:[%s2077_s20 + $0xb0] sm:$0xff]  ;;  %v522_v58 = vunpack.c.l.bf16 %v473_v55  ;;  %v855_v37 = vmax.f32 %v2328_v50, %v2331_v24 }
 0x277   : > { %v532_v51 = vunpack.c.l.bf16 %v478_v57  ;;  %v533_v52 = vunpack.c.h.bf16 %v478_v57  ;;  %v480_v57 = vld [vmem:[%s2077_s20 + $0xc0] sm:$0xff] }
 0x279   : > { %v688_v35 = vpop.f32.mrf.mxu2  ;;  %v777_v36 = vpop.f32.mrf.mxu3 }
 0x27e   : > { %820 = vmax.xlane.f32.xlu2 %v819_v38  ;;  %865 = vmax.xlane.f32.xlu0 %v864_v53  ;;  %v2338_v38 = vadd.f32 %v2272_v46, %v522_v58 }
 0x280   : > { %v861_v46 = vmax.f32 %v2338_v38, %v2341_v18 }
 0x281   : > { %v691_v48 = vpop.f32.mrf.mxu2  ;;  %v780_v59 = vpop.f32.mrf.mxu3 }
 0x282   : > { %v2319_v61 = vadd.f32 %v691_v48, %v528_v54  ;;  %v2321_v62 = vadd.f32 %v780_v59, %v529_v45  ;;  %v526_v48 = vunpack.c.l.bf16 %v475_v19  ;;  %v527_v59 = vunpack.c.h.bf16 %v475_v19 }
 0x284   : > { %v870_v49 = vmax.f32 %v2319_v61, %v2321_v62  ;;  %v2352_v7 = vadd.f32 %v688_v35, %v526_v48  ;;  %v2354_v20 = vadd.f32 %v777_v36, %v527_v59  ;;  %v479_v35 = vld [vmem:[%s2077_s20 + $0xb8] sm:$0xff] }
 0x286   : > { %814 = vmax.xlane.f32.xlu2 %v813_v21  ;;  %871 = vmax.xlane.f32.xlu0 %v870_v49  ;;  %v477_v21 = vld [vmem:[%s2077_s20 + $0xa8] sm:$0xff] }
 0x287   : > { %v530_v58 = vunpack.c.l.bf16 %v477_v21  ;;  %v531_v34 = vunpack.c.h.bf16 %v477_v21 }
 0x289   : > { %v693_v56 = vpop.f32.mrf.mxu2  ;;  %v782_v63 = vpop.f32.mrf.mxu3 }
 0x28a   : > { %v2360_v19 = vadd.f32 %v693_v56, %v530_v58  ;;  %v481_v58 = vld [vmem:[%s2077_s20 + $0xc8] sm:$0xff] }
 0x28c   : > { %2953 = vst [vmem:[#allocation10_spill] sm:$0xff] %v2360_v19 }
 0x28e   : > { %856 = vmax.xlane.f32.xlu2 %v855_v37  ;;  %v867_v37 = vmax.f32 %v2352_v7, %v2354_v20 }
 0x291   : > { %v696_v53 = vpop.f32.mrf.mxu2  ;;  %v785_v54 = vpop.f32.mrf.mxu3 }
 0x292   : > { %v2344_v45 = vadd.f32 %v696_v53, %v532_v51  ;;  %v2346_v9 = vadd.f32 %v785_v54, %v533_v52  ;;  %v536_v51 = vunpack.c.l.bf16 %v480_v57  ;;  %v537_v52 = vunpack.c.h.bf16 %v480_v57 }
 0x293   : > { %v2362_v53 = vadd.f32 %v782_v63, %v531_v34 }
 0x294   : > { %2952 = vst [vmem:[#allocation9_spill] sm:$0xff] %v2346_v9  ;;  %v876_v17 = vmax.f32 %v2344_v45, %v2346_v9 }
 0x295   : > { %2954 = vst [vmem:[#allocation11_spill] sm:$0xff] %v2362_v53  ;;  %v873_v57 = vmax.f32 %v2360_v19, %v2362_v53 }
 0x296   : > { %877 = vmax.xlane.f32.xlu0 %v876_v17  ;;  %862 = vmax.xlane.f32.xlu2 %v861_v46  ;;  %v534_v17 = vunpack.c.l.bf16 %v479_v35  ;;  %v535_v46 = vunpack.c.h.bf16 %v479_v35 }
 0x299   : > { %v698_v49 = vpop.f32.mrf.mxu2  ;;  %v787_v55 = vpop.f32.mrf.mxu3 }
 0x29a   : > { %v2373_v56 = vadd.f32 %v698_v49, %v534_v17  ;;  %v2375_v63 = vadd.f32 %v787_v55, %v535_v46 }
 0x29c   : > { %v879_v35 = vmax.f32 %v2373_v56, %v2375_v63 }
 0x29e   : > { %868 = vmax.xlane.f32.xlu2 %v867_v37 }
 0x2a1   : > { %v701_v36 = vpop.f32.mrf.mxu2  ;;  %v790_v54 = vpop.f32.mrf.mxu3 }
 0x2a2   : > { %v2365_v48 = vadd.f32 %v701_v36, %v536_v51  ;;  %v2367_v59 = vadd.f32 %v790_v54, %v537_v52  ;;  %v482_v51 = vld [vmem:[%s2077_s20 + $0xd0] sm:$0xff]  ;;  %v538_v52 = vunpack.c.l.bf16 %v481_v58  ;;  %v539_v36 = vunpack.c.h.bf16 %v481_v58 }
 0x2a3   : > { %v540_v54 = vunpack.c.l.bf16 %v482_v51  ;;  %v541_v10 = vunpack.c.h.bf16 %v482_v51 }
 0x2a4   : > { %v882_v21 = vmax.f32 %v2365_v48, %v2367_v59 }
 0x2a6   : > { %883 = vmax.xlane.f32.xlu0 %v882_v21  ;;  %874 = vmax.xlane.f32.xlu2 %v873_v57  ;;  %v483_v57 = vld [vmem:[%s2077_s20 + $0xd8] sm:$0xff] }
 0x2a7   : > { %v542_v51 = vunpack.c.l.bf16 %v483_v57 }
 0x2a9   : > { %v703_v34 = vpop.f32.mrf.mxu2  ;;  %v792_v37 = vpop.f32.mrf.mxu3 }
 0x2aa   : > { %v2381_v6 = vadd.f32 %v703_v34, %v538_v52  ;;  %v2383_v21 = vadd.f32 %v792_v37, %v539_v36  ;;  %v543_v34 = vunpack.c.h.bf16 %v483_v57 }
 0x2ac   : > { %v885_v33 = vmax.f32 %v2381_v6, %v2383_v21 }
 0x2ae   : > { %880 = vmax.xlane.f32.xlu2 %v879_v35 }
 0x2b1   : > { %v706_v49 = vpop.f32.mrf.mxu2  ;;  %v795_v55 = vpop.f32.mrf.mxu3 }
 0x2b2   : > { %v2385_v17 = vadd.f32 %v706_v49, %v540_v54  ;;  %v2387_v46 = vadd.f32 %v795_v55, %v541_v10 }
 0x2b4   : > { %v888_v58 = vmax.f32 %v2385_v17, %v2387_v46 }
 0x2b6   : > { %889 = vmax.xlane.f32.xlu0 %v888_v58  ;;  %886 = vmax.xlane.f32.xlu2 %v885_v33 }
 0x2b9   : > { %v2394_v52 = vpop.xlane.xlu2 %847  ;;  %v708_v37 = vpop.f32.mrf.mxu2 }
 0x2ba   : > { %v2396_v36 = vadd.f32 %v708_v37, %v542_v51  ;;  %v797_v35 = vpop.f32.mrf.mxu3 }
 0x2bb   : > { %v2398_v10 = vadd.f32 %v797_v35, %v543_v34 }
 0x2bd   : > { %v891_v54 = vmax.f32 %v2396_v36, %v2398_v10 }
 0x2bf   : > { %892 = vmax.xlane.f32.xlu2 %v891_v54 }
 0x2c1   : > { %v842_v49 = vpop.xlane.xlu2 %841  ;;  %v2404_v32 = vpop.xlane.xlu0 %850 }
 0x2c2   : > { %v926_v55 = vsub.f32 %v2182_v22, %v842_v49  ;;  %v927_v33 = vsub.f32 %v2184_v23, %v842_v49  ;;  %v544_v22 = vunpack.c.l.bf16 %v484_v47  ;;  %v711_v23 = vpop.f32.mrf.mxu2  ;;  %v545_v49 = vunpack.c.h.bf16 %v484_v47 }
 0x2c4   : > { %v1010_v58 = vmul.f32 1.442695, %v926_v55  ;;  %v1012_v57 = vmul.f32 1.442695, %v927_v33  ;;  %v800_v33 = vpop.f32.mrf.mxu3 }
 0x2c6   : > { %1753 = vpow2.f32 %v1010_v58 }
 0x2c7   : > { %1755 = vpow2.f32 %v1012_v57 }
 0x2c9   : > { %v845_v51 = vpop.xlane.xlu2 %844 }
 0x2ca   : > { %v928_v37 = vsub.f32 %v2204_v43, %v845_v51  ;;  %v929_v34 = vsub.f32 %v2206_v44, %v845_v51  ;;  %v830_v44 = vpop.xlane.xlu0 %829  ;;  %v2417_v51 = vadd.f32 %v711_v23, %v544_v22 }
 0x2cc   : > { %v1014_v35 = vmul.f32 1.442695, %v928_v37  ;;  %v1016_v8 = vmul.f32 1.442695, %v929_v34  ;;  %v2409_v54 = vpop.eup %1753  ;;  %v2419_v37 = vadd.f32 %v800_v33, %v545_v49 }
 0x2cd   : > { %v2411_v53 = vpop.eup %1755 }
 0x2ce   : > { %1757 = vpow2.f32 %v1014_v35  ;;  %v1128_v55 = vadd.f32 %v2411_v53, %v2409_v54  ;;  %v918_v35 = vsub.f32 %v2199_v40, %v830_v44 }
 0x2cf   : > { %1759 = vpow2.f32 %v1016_v8  ;;  %v919_v8 = vsub.f32 %v2201_v41, %v830_v44 }
 0x2d0   : > { %1129 = vadd.xlane.f32.xlu0 %v1128_v55  ;;  %v994_v23 = vmul.f32 1.442695, %v918_v35 }
 0x2d1   : > { %v836_v58 = vpop.xlane.xlu2 %835  ;;  %v996_v55 = vmul.f32 1.442695, %v919_v8 }
 0x2d2   : > { %v922_v43 = vsub.f32 %v2226_v15, %v836_v58  ;;  %v923_v57 = vsub.f32 %v2229_v16, %v836_v58  ;;  %v894_v15 = vmax.f32 %v2417_v51, %v2419_v37 }
 0x2d4   : > { %v1002_v34 = vmul.f32 1.442695, %v922_v43  ;;  %v1004_v19 = vmul.f32 1.442695, %v923_v57  ;;  %v2421_v47 = vpop.eup %1757  ;;  %v930_v43 = vsub.f32 %v2174_v13, %v2394_v52  ;;  %v2441_v57 = vpop.xlane.xlu0 %823  ;;  %v932_v13 = vsub.f32 %v2187_v27, %v2404_v32 }
 0x2d5   : > { %v2424_v9 = vpop.eup %1759 }
 0x2d6   : > { %1761 = vpow2.f32 %v1002_v34  ;;  %v1131_v16 = vadd.f32 %v2424_v9, %v2421_v47  ;;  %v1018_v35 = vmul.f32 1.442695, %v930_v43 }
 0x2d7   : > { %1763 = vpow2.f32 %v1004_v19  ;;  %v931_v19 = vsub.f32 %v2176_v14, %v2394_v52  ;;  %v933_v14 = vsub.f32 %v2189_v28, %v2404_v32  ;;  %v713_v28 = vpop.f32.mrf.mxu2  ;;  %v802_v32 = vpop.f32.mrf.mxu3 }
 0x2d8   : > { %895 = vmax.xlane.f32.xlu0 %v894_v15  ;;  %1132 = vadd.xlane.f32.xlu2 %v1131_v16  ;;  %1765 = vpow2.f32 %v994_v23  ;;  %v485_v15 = vld [vmem:[%s2077_s20 + $0xe8] sm:$0xff] }
 0x2d9   : > { %v839_v22 = vpop.xlane.xlu2 %838  ;;  %1767 = vpow2.f32 %v996_v55  ;;  %v1020_v8 = vmul.f32 1.442695, %v931_v19  ;;  %v1022_v55 = vmul.f32 1.442695, %v932_v13  ;;  %v1024_v27 = vmul.f32 1.442695, %v933_v14 }
 0x2da   : > { %v924_v49 = vsub.f32 %v2248_v29, %v839_v22  ;;  %v925_v40 = vsub.f32 %v2251_v30, %v839_v22  ;;  %v854_v30 = vpop.xlane.xlu1 %853 }
 0x2db   : > { %v934_v16 = vsub.f32 %v2208_v3, %v854_v30  ;;  %v935_v23 = vsub.f32 %v2210_v4, %v854_v30 }
 0x2dc   : > { %v1006_v33 = vmul.f32 1.442695, %v924_v49  ;;  %v1008_v58 = vmul.f32 1.442695, %v925_v40  ;;  %v2433_v41 = vpop.eup %1761 }
 0x2dd   : > { %2955 = vst [vmem:[#allocation12_spill] sm:$0xff] %v2433_v41  ;;  %v2437_v44 = vpop.eup %1763  ;;  %v1026_v43 = vmul.f32 1.442695, %v934_v16  ;;  %v1028_v4 = vmul.f32 1.442695, %v935_v23 }
 0x2de   : > { %2956 = vst [vmem:[#allocation13_spill] sm:$0xff] %v2437_v44  ;;  %1769 = vpow2.f32 %v1006_v33  ;;  %v1122_v29 = vadd.f32 %v2437_v44, %v2433_v41  ;;  %v2451_v52 = vpop.eup %1765  ;;  %v546_v33 = vunpack.c.l.bf16 %v485_v15 }
 0x2df   : > { %1771 = vpow2.f32 %v1008_v58  ;;  %2957 = vst [vmem:[#allocation14_spill] sm:$0xff] %v2451_v52  ;;  %v2455_v22 = vpop.eup %1767  ;;  %v547_v58 = vunpack.c.h.bf16 %v485_v15 }
 0x2e0   : > { %1123 = vadd.xlane.f32.xlu0 %v1122_v29  ;;  %2958 = vst [vmem:[#allocation15_spill] sm:$0xff] %v2455_v22  ;;  %1773 = vpow2.f32 %v1018_v35  ;;  %v1116_v3 = vadd.f32 %v2455_v22, %v2451_v52  ;;  %v818_v29 = vpop.xlane.xlu0 %817 }
 0x2e1   : > { %v2445_v34 = vpop.xlane.xlu2 %832  ;;  %1775 = vpow2.f32 %v1020_v8  ;;  %v2468_v8 = vadd.f32 %v713_v28, %v546_v33  ;;  %v2470_v14 = vadd.f32 %v802_v32, %v547_v58  ;;  %v910_v16 = vsub.f32 %v2242_v25, %v818_v29 }
 0x2e2   : > { %1777 = vpow2.f32 %v1022_v55 }
 0x2e3   : > { %1779 = vpow2.f32 %v1024_v27  ;;  %v978_v55 = vmul.f32 1.442695, %v910_v16  ;;  %v897_v33 = vmax.f32 %v2468_v8, %v2470_v14 }
 0x2e4   : > { %v2458_v49 = vpop.eup %1769  ;;  %1781 = vpow2.f32 %v1026_v43 }
 0x2e5   : > { %2959 = vst [vmem:[#allocation16_spill] sm:$0xff] %v2458_v49  ;;  %v2460_v40 = vpop.eup %1771  ;;  %1783 = vpow2.f32 %v1028_v4  ;;  %v716_v4 = vpop.f32.mrf.mxu2 }
 0x2e6   : > { %2960 = vst [vmem:[#allocation17_spill] sm:$0xff] %v2460_v40  ;;  %v1125_v19 = vadd.f32 %v2460_v40, %v2458_v49  ;;  %v2472_v15 = vpop.eup %1773 }
 0x2e7   : > { %v2475_v52 = vpop.eup %1775 }
 0x2e8   : > { %1117 = vadd.xlane.f32.xlu0 %v1116_v3  ;;  %1126 = vadd.xlane.f32.xlu2 %v1125_v19  ;;  %v1134_v27 = vadd.f32 %v2475_v52, %v2472_v15  ;;  %v2522_v44 = vpop.xlane.xlu0 %811 }
 0x2e9   : > { %v827_v30 = vpop.xlane.xlu2 %826 }
 0x2ea   : > { %v916_v35 = vsub.f32 %v2282_v60, %v827_v30  ;;  %v917_v13 = vsub.f32 %v2285_v5, %v827_v30  ;;  %v911_v60 = vsub.f32 %v2245_v26, %v818_v29  ;;  %v2478_v5 = vpop.eup %1777 }
 0x2eb   : > { %v2484_v25 = vpop.eup %1779 }
 0x2ec   : > { %v990_v23 = vmul.f32 1.442695, %v916_v35  ;;  %v992_v22 = vmul.f32 1.442695, %v917_v13  ;;  %v980_v58 = vmul.f32 1.442695, %v911_v60  ;;  %v2488_v32 = vpop.eup %1781  ;;  %v805_v35 = vpop.f32.mrf.mxu3  ;;  %v1137_v13 = vadd.f32 %v2484_v25, %v2478_v5 }
 0x2ed   : > { %v2490_v26 = vpop.eup %1783 }
 0x2ee   : > { %1785 = vpow2.f32 %v990_v23  ;;  %v1140_v16 = vadd.f32 %v2490_v26, %v2488_v32 }
 0x2ef   : > { %1787 = vpow2.f32 %v992_v22  ;;  %v486_v22 = vld [vmem:[%s2077_s20 + $0xf0] sm:$0xff] }
 0x2f0   : > { %1135 = vadd.xlane.f32.xlu0 %v1134_v27  ;;  %898 = vmax.xlane.f32.xlu2 %v897_v33  ;;  %1789 = vpow2.f32 %v978_v55  ;;  %v548_v19 = vunpack.c.l.bf16 %v486_v22  ;;  %v549_v29 = vunpack.c.h.bf16 %v486_v22  ;;  %v920_v22 = vsub.f32 %v2266_v39, %v2445_v34 }
 0x2f1   : > { %v2486_v28 = vpop.xlane.xlu2 %820  ;;  %1791 = vpow2.f32 %v980_v58  ;;  %v487_v58 = vld [vmem:[%s2077_s20 + $0xf8] sm:$0xff] }
 0x2f2   : > { %v2507_v55 = vadd.f32 %v716_v4, %v548_v19  ;;  %v2509_v27 = vadd.f32 %v805_v35, %v549_v29  ;;  %v921_v19 = vsub.f32 %v2269_v42, %v2445_v34  ;;  %v550_v4 = vunpack.c.l.bf16 %v487_v58  ;;  %v718_v29 = vpop.f32.mrf.mxu2 }
 0x2f3   : > { %v551_v35 = vunpack.c.h.bf16 %v487_v58 }
 0x2f4   : > { %v2493_v43 = vpop.eup %1785  ;;  %v1000_v39 = vmul.f32 1.442695, %v921_v19  ;;  %v2524_v41 = vadd.f32 %v718_v29, %v550_v4  ;;  %v2536_v4 = vpop.xlane.xlu0 %859 }
 0x2f5   : > { %2961 = vst [vmem:[#allocation18_spill] sm:$0xff] %v2493_v43  ;;  %v2495_v3 = vpop.eup %1787 }
 0x2f6   : > { %2962 = vst [vmem:[#allocation19_spill] sm:$0xff] %v2495_v3  ;;  %v1113_v30 = vadd.f32 %v2495_v3, %v2493_v43  ;;  %v2505_v60 = vpop.eup %1789  ;;  %v900_v3 = vmax.f32 %v2507_v55, %v2509_v27  ;;  %v998_v43 = vmul.f32 1.442695, %v920_v22 }
 0x2f7   : > { %2963 = vst [vmem:[#allocation20_spill] sm:$0xff] %v2505_v60  ;;  %v2511_v33 = vpop.eup %1791 }
 0x2f8   : > { %1114 = vadd.xlane.f32.xlu1 %v1113_v30  ;;  %1138 = vadd.xlane.f32.xlu2 %v1137_v13  ;;  %2964 = vst [vmem:[#allocation21_spill] sm:$0xff] %v2511_v33  ;;  %v1104_v30 = vadd.f32 %v2511_v33, %v2505_v60  ;;  %v807_v13 = vpop.f32.mrf.mxu3  ;;  %1793 = vpow2.f32 %v998_v43 }
 0x2f9   : > { %v2503_v23 = vpop.xlane.xlu2 %814  ;;  %1141 = vadd.xlane.f32.xlu0 %v1140_v16  ;;  %v2526_v33 = vadd.f32 %v807_v13, %v551_v35  ;;  %1795 = vpow2.f32 %v1000_v39  ;;  %2967 = vst [vmem:[#allocation24_spill] sm:$0xff] %v2536_v4 }
 0x2fb   : > { %v903_v34 = vmax.f32 %v2524_v41, %v2526_v33 }
 0x2fe   : > { %v2532_v22 = vpop.eup %1793 }
 0x2ff   : > { %2965 = vst [vmem:[#allocation22_spill] sm:$0xff] %v2532_v22  ;;  %v2534_v19 = vpop.eup %1795 }
 0x300   : > { %1105 = vadd.xlane.f32.xlu1 %v1104_v30  ;;  %901 = vmax.xlane.f32.xlu2 %v900_v3  ;;  %2966 = vst [vmem:[#allocation23_spill] sm:$0xff] %v2534_v19 }
 0x301   : > { %v857_v16 = vpop.xlane.xlu2 %856 }
 0x302   : > { %v936_v60 = vsub.f32 %v2328_v50, %v857_v16  ;;  %v937_v42 = vsub.f32 %v2331_v24, %v857_v16  ;;  %v1119_v50 = vadd.f32 %v2534_v19, %v2532_v22 }
 0x304   : > { %v1030_v30 = vmul.f32 1.442695, %v936_v60  ;;  %v1032_v3 = vmul.f32 1.442695, %v937_v42  ;;  %v2544_v60 = vpop.xlane.xlu0 %865 }
 0x306   : > { %1797 = vpow2.f32 %v1030_v30 }
 0x307   : > { %1799 = vpow2.f32 %v1032_v3 }
 0x308   : > { %904 = vmax.xlane.f32.xlu2 %v903_v34 }
 0x309   : > { %v863_v58 = vpop.xlane.xlu2 %862 }
 0x30c   : > { %v2540_v24 = vpop.eup %1797  ;;  %v872_v16 = vpop.xlane.xlu0 %871 }
 0x30d   : > { %v2542_v29 = vpop.eup %1799  ;;  %v946_v30 = vsub.f32 %v2319_v61, %v872_v16  ;;  %v947_v19 = vsub.f32 %v2321_v62, %v872_v16 }
 0x30e   : > { %v1143_v35 = vadd.f32 %v2542_v29, %v2540_v24 }
 0x30f   : > { %v1050_v22 = vmul.f32 1.442695, %v946_v30  ;;  %v1052_v40 = vmul.f32 1.442695, %v947_v19 }
 0x310   : > { %1120 = vadd.xlane.f32.xlu2 %v1119_v50 }
 0x311   : > { %v869_v43 = vpop.xlane.xlu2 %868 }
 0x312   : > { %v945_v61 = vsub.f32 %v2354_v20, %v869_v43 }
 0x314   : > { %v1048_v16 = vmul.f32 1.442695, %v945_v61 }
 0x318   : > { %1144 = vadd.xlane.f32.xlu2 %v1143_v35  ;;  %v944_v35 = vsub.f32 %v2352_v7, %v869_v43  ;;  %v941_v7 = vsub.f32 %v2341_v18, %v863_v58 }
 0x319   : > { %v2548_v13 = vpop.xlane.xlu2 %874 }
 0x31a   : > { %v1046_v62 = vmul.f32 1.442695, %v944_v35 }
 0x321   : > { %v881_v39 = vpop.xlane.xlu2 %880 }
 0x322   : > { %v952_v42 = vsub.f32 %v2373_v56, %v881_v39  ;;  %v953_v34 = vsub.f32 %v2375_v63, %v881_v39  ;;  %v2559_v56 = vpop.xlane.xlu0 %877 }
 0x324   : > { %v1062_v3 = vmul.f32 1.442695, %v952_v42  ;;  %v1064_v50 = vmul.f32 1.442695, %v953_v34  ;;  %v1040_v42 = vmul.f32 1.442695, %v941_v7 }
 0x326   : > { %1801 = vpow2.f32 %v1062_v3 }
 0x327   : > { %1803 = vpow2.f32 %v1064_v50 }
 0x328   : > { %1805 = vpow2.f32 %v1050_v22  ;;  %v940_v22 = vsub.f32 %v2338_v38, %v863_v58 }
 0x329   : > { %1807 = vpow2.f32 %v1052_v40  ;;  %v2578_v3 = vpop.xlane.xlu2 %886 }
 0x32a   : > { %1809 = vpow2.f32 %v1046_v62  ;;  %v2570_v40 = vpop.xlane.xlu0 %883  ;;  %v1038_v43 = vmul.f32 1.442695, %v940_v22 }
 0x32b   : > { %1811 = vpow2.f32 %v1048_v16 }
 0x32c   : > { %v2554_v49 = vpop.eup %1801  ;;  %1813 = vpow2.f32 %v1038_v43 }
 0x32d   : > { %v2557_v4 = vpop.eup %1803  ;;  %1815 = vpow2.f32 %v1040_v42 }
 0x32e   : > { %v1167_v63 = vadd.f32 %v2557_v4, %v2554_v49  ;;  %v2564_v39 = vpop.eup %1805 }
 0x32f   : > { %v2566_v19 = vpop.eup %1807 }
 0x330   : > { %1168 = vadd.xlane.f32.xlu1 %v1167_v63  ;;  %v1158_v20 = vadd.f32 %v2566_v19, %v2564_v39  ;;  %v2574_v34 = vpop.eup %1809 }
 0x331   : > { %v2576_v30 = vpop.eup %1811 }
 0x332   : > { %2968 = vst [vmem:[#allocation25_spill] sm:$0xff] %v2576_v30  ;;  %v2580_v38 = vpop.xlane.xlu0 %889  ;;  %v1155_v18 = vadd.f32 %v2576_v30, %v2574_v34  ;;  %v2584_v58 = vpop.eup %1813 }
 0x333   : > { %2969 = vst [vmem:[#allocation26_spill] sm:$0xff] %v2584_v58  ;;  %v2586_v50 = vpop.eup %1815  ;;  %v893_v35 = vpop.xlane.xlu2 %892 }
 0x334   : > { %2970 = vst [vmem:[#allocation27_spill] sm:$0xff] %v2586_v50  ;;  %v1149_v63 = vadd.f32 %v2586_v50, %v2584_v58 }
 0x338   : > { %1159 = vadd.xlane.f32.xlu1 %v1158_v20 }
 0x340   : > { %1156 = vadd.xlane.f32.xlu1 %v1155_v18 }
 0x343   : > { %v1130_v61 = vpop.xlane.xlu0 %1129 }
 0x344   : > { %1817 = vrcp.f32 %v1130_v61 }
 0x348   : > { %1150 = vadd.xlane.f32.xlu1 %v1149_v63 }
 0x34a   : > { %v1818_v42 = vpop.eup %1817 }
 0x34b   : > { %v896_v62 = vpop.xlane.xlu0 %895  ;;  %v1133_v16 = vpop.xlane.xlu2 %1132  ;;  %v2593_v30 = vmul.f32 %v1818_v42, %v2409_v54  ;;  %v2599_v61 = vmul.f32 %v1818_v42, %v2411_v53  ;;  %v961_v42 = vsub.f32 %v2398_v10, %v893_v35 }
 0x34c   : > { %v962_v22 = vsub.f32 %v2417_v51, %v896_v62  ;;  %v963_v7 = vsub.f32 %v2419_v37, %v896_v62  ;;  %1819 = vrcp.f32 %v1133_v16 }
 0x34d   : > { %v1080_v37 = vmul.f32 1.442695, %v961_v42 }
 0x34e   : > { %v1082_v20 = vmul.f32 1.442695, %v962_v22  ;;  %v1084_v43 = vmul.f32 1.442695, %v963_v7  ;;  %v960_v7 = vsub.f32 %v2396_v36, %v893_v35  ;;  %v955_v36 = vsub.f32 %v2367_v59, %v2570_v40 }
 0x350   : > { %1821 = vpow2.f32 %v1082_v20  ;;  %v1078_v63 = vmul.f32 1.442695, %v960_v7 }
 0x351   : > { %1823 = vpow2.f32 %v1084_v43 }
 0x352   : > { %v1820_v18 = vpop.eup %1819 }
 0x353   : > { %v2596_v50 = vmul.f32 %v1820_v18, %v2421_v47  ;;  %v2602_v51 = vmul.f32 %v1820_v18, %v2424_v9  ;;  %v2620_v18 = vpop.xlane.xlu0 %1123 }
 0x356   : > { %v2608_v62 = vpop.eup %1821 }
 0x357   : > { %v2610_v16 = vpop.eup %1823 }
 0x358   : > { %v1182_v54 = vadd.f32 %v2610_v16, %v2608_v62 }
 0x35a   : > { %1183 = vadd.xlane.f32.xlu0 %v1182_v54 }
 0x35b   : > { %v2614_v47 = vpop.xlane.xlu2 %1126 }
 0x363   : > { %v899_v53 = vpop.xlane.xlu2 %898 }
 0x364   : > { %v964_v9 = vsub.f32 %v2468_v8, %v899_v53  ;;  %v965_v22 = vsub.f32 %v2470_v14, %v899_v53  ;;  %v954_v8 = vsub.f32 %v2365_v48, %v2570_v40  ;;  %v1068_v53 = vmul.f32 1.442695, %v955_v36 }
 0x365   : > { %v912_v48 = vsub.f32 %v2297_v0, %v2486_v28  ;;  %v913_v40 = vsub.f32 %v2300_v31, %v2486_v28 }
 0x366   : > { %v1086_v20 = vmul.f32 1.442695, %v964_v9  ;;  %v1088_v43 = vmul.f32 1.442695, %v965_v22  ;;  %v1066_v35 = vmul.f32 1.442695, %v954_v8  ;;  %v2634_v9 = vpop.xlane.xlu0 %1117  ;;  %v959_v8 = vsub.f32 %v2387_v46, %v2580_v38 }
 0x367   : > { %v982_v0 = vmul.f32 1.442695, %v912_v48  ;;  %v915_v46 = vsub.f32 %v2223_v12, %v2441_v57 }
 0x368   : > { %1825 = vpow2.f32 %v1086_v20  ;;  %v1076_v31 = vmul.f32 1.442695, %v959_v8 }
 0x369   : > { %1827 = vpow2.f32 %v1088_v43  ;;  %v988_v12 = vmul.f32 1.442695, %v915_v46 }
 0x36a   : > { %1829 = vpow2.f32 %v1078_v63 }
 0x36b   : > { %v2622_v54 = vpop.xlane.xlu2 %1138  ;;  %1831 = vpow2.f32 %v1080_v37  ;;  %v958_v37 = vsub.f32 %v2385_v17, %v2580_v38  ;;  %v914_v17 = vsub.f32 %v2220_v11, %v2441_v57 }
 0x36c   : > { %1833 = vpow2.f32 %v1066_v35 }
 0x36d   : > { %1835 = vpow2.f32 %v1068_v53  ;;  %v1074_v36 = vmul.f32 1.442695, %v958_v37 }
 0x36e   : > { %v2624_v58 = vpop.eup %1825  ;;  %v1136_v38 = vpop.xlane.xlu0 %1135 }
 0x36f   : > { %v2628_v14 = vpop.eup %1827 }
 0x370   : > { %v1185_v10 = vadd.f32 %v2628_v14, %v2624_v58  ;;  %v2636_v7 = vpop.eup %1829 }
 0x371   : > { %v2642_v59 = vpop.eup %1831 }
 0x372   : > { %1186 = vadd.xlane.f32.xlu2 %v1185_v10  ;;  %v2652_v10 = vpop.eup %1833 }
 0x373   : > { %v902_v22 = vpop.xlane.xlu2 %901  ;;  %v2656_v35 = vpop.eup %1835 }
 0x374   : > { %v966_v63 = vsub.f32 %v2507_v55, %v902_v22  ;;  %v967_v20 = vsub.f32 %v2509_v27, %v902_v22  ;;  %v1179_v55 = vadd.f32 %v2642_v59, %v2636_v7  ;;  %v984_v27 = vmul.f32 1.442695, %v913_v40 }
 0x375   : > { %v1170_v11 = vadd.f32 %v2656_v35, %v2652_v10 }
 0x376   : > { %v1090_v43 = vmul.f32 1.442695, %v966_v63  ;;  %v1092_v42 = vmul.f32 1.442695, %v967_v20  ;;  %v986_v20 = vmul.f32 1.442695, %v914_v17 }
 0x378   : > { %1837 = vpow2.f32 %v1090_v43 }
 0x379   : > { %1839 = vpow2.f32 %v1092_v42 }
 0x37a   : > { %1180 = vadd.xlane.f32.xlu2 %v1179_v55  ;;  %1841 = vpow2.f32 %v982_v0  ;;  %v907_v55 = vsub.f32 %v2262_v2, %v2522_v44 }
 0x37b   : > { %v905_v28 = vpop.xlane.xlu2 %904  ;;  %1843 = vpow2.f32 %v984_v27  ;;  %v956_v27 = vsub.f32 %v2381_v6, %v2578_v3 }
 0x37c   : > { %1845 = vpow2.f32 %v1074_v36  ;;  %v968_v22 = vsub.f32 %v2524_v41, %v905_v28  ;;  %v969_v63 = vsub.f32 %v2526_v33, %v905_v28  ;;  %v906_v41 = vsub.f32 %v2259_v1, %v2522_v44 }
 0x37d   : > { %1847 = vpow2.f32 %v1076_v31  ;;  %v957_v1 = vsub.f32 %v2383_v21, %v2578_v3  ;;  %v1142_v31 = vpop.xlane.xlu0 %1141  ;;  %v972_v46 = vmul.f32 1.442695, %v907_v55  ;;  %v1070_v2 = vmul.f32 1.442695, %v956_v27 }
 0x37e   : > { %v2660_v53 = vpop.eup %1837  ;;  %v1094_v37 = vmul.f32 1.442695, %v968_v22  ;;  %v1096_v42 = vmul.f32 1.442695, %v969_v63  ;;  %1849 = vpow2.f32 %v986_v20  ;;  %v970_v36 = vmul.f32 1.442695, %v906_v41 }
 0x37f   : > { %v2663_v48 = vpop.eup %1839  ;;  %1851 = vpow2.f32 %v988_v12  ;;  %v1072_v44 = vmul.f32 1.442695, %v957_v1  ;;  %v950_v63 = vsub.f32 %v2344_v45, %v2559_v56  ;;  %v2972_v12 = vld [vmem:[#allocation10_spill] sm:$0xff]  ;;  %v2973_v41 = vld [vmem:[#allocation11_spill] sm:$0xff] }
 0x380   : > { %v1188_v40 = vadd.f32 %v2663_v48, %v2660_v53  ;;  %v2670_v57 = vpop.eup %1841  ;;  %1853 = vpow2.f32 %v1094_v37  ;;  %v948_v37 = vsub.f32 %v2972_v12, %v2548_v13  ;;  %v2974_v12 = vld [vmem:[#allocation7_spill] sm:$0xff] }
 0x381   : > { %v2672_v43 = vpop.eup %1843  ;;  %1855 = vpow2.f32 %v1096_v42  ;;  %v949_v42 = vsub.f32 %v2973_v41, %v2548_v13  ;;  %v1058_v27 = vmul.f32 1.442695, %v950_v63 }
 0x382   : > { %1171 = vadd.xlane.f32.xlu2 %v1170_v11  ;;  %1189 = vadd.xlane.f32.xlu0 %v1188_v40  ;;  %v2678_v8 = vpop.eup %1845  ;;  %v1107_v28 = vadd.f32 %v2672_v43, %v2670_v57  ;;  %1857 = vrcp.f32 %v1142_v31  ;;  %v2971_v11 = vld [vmem:[#allocation9_spill] sm:$0xff] }
 0x383   : > { %v2676_v33 = vpop.xlane.xlu2 %1120  ;;  %v2680_v0 = vpop.eup %1847  ;;  %1859 = vpow2.f32 %v970_v36  ;;  %v951_v40 = vsub.f32 %v2971_v11, %v2559_v56 }
 0x384   : > { %v1176_v17 = vadd.f32 %v2680_v0, %v2678_v8  ;;  %v2692_v22 = vpop.eup %1849 }
 0x385   : > { %v2694_v6 = vpop.eup %1851  ;;  %v1060_v56 = vmul.f32 1.442695, %v951_v40 }
 0x386   : > { %v2696_v3 = vpop.eup %1853  ;;  %v1110_v36 = vadd.f32 %v2694_v6, %v2692_v22 }
 0x387   : > { %v2700_v20 = vpop.eup %1855 }
 0x388   : > { %v1858_v55 = vpop.eup %1857  ;;  %v1191_v45 = vadd.f32 %v2700_v20, %v2696_v3 }
 0x389   : > { %v2713_v1 = vpop.eup %1859 }
 0x38a   : > { %1108 = vadd.xlane.f32.xlu2 %v1107_v28  ;;  %1177 = vadd.xlane.f32.xlu0 %v1176_v17  ;;  %v1054_v28 = vmul.f32 1.442695, %v948_v37  ;;  %v1056_v17 = vmul.f32 1.442695, %v949_v42  ;;  %v908_v37 = vsub.f32 %v2974_v12, %v2503_v23 }
 0x38b   : > { %v1145_v21 = vpop.xlane.xlu2 %1144 }
 0x38c   : > { %1861 = vrcp.f32 %v1145_v21 }
 0x38d   : > { %1863 = vpow2.f32 %v972_v46  ;;  %v1254_v46 = vmul.f32 %v1858_v55, %v2488_v32  ;;  %v2975_v32 = vld [vmem:[#allocation8_spill] sm:$0xff] }
 0x38e   : > { %1865 = vpow2.f32 %v1070_v2  ;;  %v1255_v2 = vmul.f32 %v1858_v55, %v2490_v26 }
 0x38f   : > { %1867 = vpow2.f32 %v1072_v44 }
 0x390   : > { %1869 = vrcp.f32 %v2622_v54 }
 0x391   : > { %1871 = vrcp.f32 %v1136_v38 }
 0x392   : > { %v1862_v31 = vpop.eup %1861  ;;  %1192 = vadd.xlane.f32.xlu2 %v1191_v45  ;;  %1111 = vadd.xlane.f32.xlu0 %v1110_v36  ;;  %1873 = vpow2.f32 %v1058_v27  ;;  %v974_v45 = vmul.f32 1.442695, %v908_v37  ;;  %v2978_v37 = vld [vmem:[#allocation24_spill] sm:$0xff] }
 0x393   : > { %v2715_v13 = vpop.eup %1863  ;;  %v1256_v54 = vmul.f32 %v1862_v31, %v2540_v24  ;;  %v1257_v44 = vmul.f32 %v1862_v31, %v2542_v29  ;;  %1875 = vpow2.f32 %v1060_v56  ;;  %v909_v24 = vsub.f32 %v2975_v32, %v2503_v23  ;;  %v2979_v32 = vld [vmem:[#allocation3_spill] sm:$0xff] }
 0x394   : > { %v2721_v21 = vpop.eup %1865  ;;  %1877 = vpow2.f32 %v1054_v28  ;;  %v1098_v29 = vadd.f32 %v2715_v13, %v2713_v1 }
 0x395   : > { %v2723_v63 = vpop.eup %1867  ;;  %v1304_v11 = vpack.c.bf16 %v1256_v54, %v1254_v46  ;;  %v1305_v38 = vpack.c.bf16 %v1257_v44, %v1255_v2  ;;  %1879 = vpow2.f32 %v1056_v17  ;;  %v976_v36 = vmul.f32 1.442695, %v909_v24  ;;  %v2977_v2 = vld [vmem:[#allocation6_spill] sm:$0xff]  ;;  %v2980_v24 = vld [vmem:[#allocation4_spill] sm:$0xff] }
 0x396   : > { %v1870_v40 = vpop.eup %1869  ;;  %v1173_v41 = vadd.f32 %v2723_v63, %v2721_v21  ;;  %1881 = vpow2.f32 %v974_v45  ;;  %v943_v44 = vsub.f32 %v2977_v2, %v2544_v60 }
 0x397   : > { %1322 = vmatpush.bf16.xpose.msrb.mxu0 %v1304_v11  ;;  %1335 = vmatpush.bf16.xpose.msrb.mxu1 %v1305_v38  ;;  %v1872_v26 = vpop.eup %1871  ;;  %v1252_v42 = vmul.f32 %v1870_v40, %v2478_v5  ;;  %v1253_v55 = vmul.f32 %v1870_v40, %v2484_v25  ;;  %v2976_v25 = vld [vmem:[#allocation5_spill] sm:$0xff]  ;;  %1883 = vpow2.f32 %v976_v36 }
 0x398   : > { %v2735_v27 = vpop.eup %1873  ;;  %v1250_v56 = vmul.f32 %v1872_v26, %v2472_v15  ;;  %v1251_v31 = vmul.f32 %v1872_v26, %v2475_v52  ;;  %v942_v54 = vsub.f32 %v2976_v25, %v2544_v60  ;;  %1885 = vrcp.f32 %v2614_v47  ;;  %v2984_v36 = vld [vmem:[#allocation17_spill] sm:$0xff] }
 0x399   : > { %v2737_v23 = vpop.eup %1875  ;;  %1887 = vrcp.f32 %v2620_v18  ;;  %v1044_v38 = vmul.f32 1.442695, %v943_v44  ;;  %v938_v47 = vsub.f32 %v2979_v32, %v2978_v37  ;;  %v939_v26 = vsub.f32 %v2980_v24, %v2978_v37  ;;  %v359_v44 = vld [vmem:[%s2067_s14 + $0x10] sm:$0xff]  ;;  %v2989_v37 = vld [vmem:[#allocation14_spill] sm:$0xff] }
 0x39a   : > { %1099 = vadd.xlane.f32.xlu2 %v1098_v29  ;;  %1174 = vadd.xlane.f32.xlu0 %v1173_v41  ;;  %v2741_v28 = vpop.eup %1877  ;;  %v1302_v46 = vpack.c.bf16 %v1252_v42, %v1250_v56  ;;  %v1303_v5 = vpack.c.bf16 %v1253_v55, %v1251_v31  ;;  %v1164_v15 = vadd.f32 %v2737_v23, %v2735_v27  ;;  %v1042_v11 = vmul.f32 1.442695, %v942_v54  ;;  %v2983_v55 = vld [vmem:[#allocation16_spill] sm:$0xff] }
 0x39b   : > { %v2743_v17 = vpop.eup %1879  ;;  %v2981_v29 = vpack.c.bf16 %v2596_v50, %v2593_v30  ;;  %v2982_v18 = vpack.c.bf16 %v2602_v51, %v2599_v61  ;;  %v1034_v31 = vmul.f32 1.442695, %v938_v47  ;;  %v1036_v30 = vmul.f32 1.442695, %v939_v26  ;;  %v2985_v50 = vld [vmem:[#allocation12_spill] sm:$0xff]  ;;  %v2986_v61 = vld [vmem:[#allocation13_spill] sm:$0xff]  ;;  %1656 = vmatmul.msk.f32.gmra.mxu0 %vm386_vm0, %v359_v44  ;;  %1659 = vmatmul.msk.f32.gmra.mxu1 %vm386_vm0, %v359_v44 }
 0x39c   : > { %v1161_v52 = vadd.f32 %v2743_v17, %v2741_v28  ;;  %v2755_v40 = vpop.eup %1881  ;;  %1889 = vpow2.f32 %v1042_v11  ;;  %v2990_v47 = vld [vmem:[#allocation15_spill] sm:$0xff] }
 0x39d   : > { %v2757_v60 = vpop.eup %1883  ;;  %1891 = vpow2.f32 %v1044_v38  ;;  %v2988_v38 = vld [vmem:[#allocation23_spill] sm:$0xff] }
 0x39e   : > { %v1886_v12 = vpop.eup %1885  ;;  %1893 = vrcp.f32 %v2676_v33  ;;  %v1101_v42 = vadd.f32 %v2757_v60, %v2755_v40 }
 0x39f   : > { %1323 = vmatpush.bf16.xpose.msrb.mxu0 %v1302_v46  ;;  %1336 = vmatpush.bf16.xpose.msrb.mxu1 %v1303_v5  ;;  %v1888_v41 = vpop.eup %1887  ;;  %v1244_v45 = vmul.f32 %v1886_v12, %v2983_v55  ;;  %v1245_v56 = vmul.f32 %v1886_v12, %v2984_v36  ;;  %1895 = vrcp.f32 %v2634_v9  ;;  %v370_v55 = vld [vmem:[%s2072_s17 + $0x10] sm:$0xff] }
 0x3a0   : > { %v1242_v46 = vmul.f32 %v1888_v41, %v2985_v50  ;;  %v1243_v51 = vmul.f32 %v1888_v41, %v2986_v61  ;;  %1897 = vpow2.f32 %v1034_v31 }
 0x3a1   : > { %1899 = vpow2.f32 %v1036_v30 }
 0x3a2   : > { %1162 = vadd.xlane.f32.xlu2 %v1161_v52  ;;  %1165 = vadd.xlane.f32.xlu0 %v1164_v15  ;;  %v2777_v5 = vpop.eup %1889  ;;  %v1298_v25 = vpack.c.bf16 %v1244_v45, %v1242_v46  ;;  %v1299_v54 = vpack.c.bf16 %v1245_v56, %v1243_v51  ;;  %v2987_v15 = vld [vmem:[#allocation22_spill] sm:$0xff]  ;;  %v1115_v46 = vpop.xlane.xlu1 %1114 }
 0x3a3   : > { %v2779_v33 = vpop.eup %1891  ;;  %1901 = vrcp.f32 %v1115_v46 }
 0x3a4   : > { %v1894_v2 = vpop.eup %1893  ;;  %v1152_v9 = vadd.f32 %v2779_v33, %v2777_v5 }
 0x3a5   : > { %v1896_v52 = vpop.eup %1895  ;;  %v1240_v11 = vmul.f32 %v1894_v2, %v2987_v15  ;;  %v1241_v12 = vmul.f32 %v1894_v2, %v2988_v38  ;;  %v2992_v38 = vld [vmem:[#allocation19_spill] sm:$0xff] }
 0x3a6   : > { %v1238_v32 = vmul.f32 %v1896_v52, %v2989_v37  ;;  %v1239_v24 = vmul.f32 %v1896_v52, %v2990_v47  ;;  %v2790_v26 = vpop.eup %1897 }
 0x3a7   : > { %1324 = vmatpush.bf16.xpose.msrb.mxu0 %v2981_v29  ;;  %1337 = vmatpush.bf16.xpose.msrb.mxu1 %v2982_v18  ;;  %v2792_v29 = vpop.eup %1899 }
 0x3a8   : > { %v1296_v18 = vpack.c.bf16 %v1240_v11, %v1238_v32  ;;  %v1297_v41 = vpack.c.bf16 %v1241_v12, %v1239_v24 }
 0x3aa   : > { %1102 = vadd.xlane.f32.xlu0 %v1101_v42  ;;  %v1146_v42 = vadd.f32 %v2792_v29, %v2790_v26 }
 0x3af   : > { %1325 = vmatpush.bf16.xpose.msrb.mxu0 %v1298_v25  ;;  %1338 = vmatpush.bf16.xpose.msrb.mxu1 %v1299_v54  ;;  %v1106_v25 = vpop.xlane.xlu1 %1105  ;;  %v1902_v54 = vpop.eup %1901 }
 0x3b0   : > { %v1237_v12 = vmul.f32 %v1902_v54, %v2992_v38 }
 0x3b2   : > { %1153 = vadd.xlane.f32.xlu0 %v1152_v9  ;;  %v2991_v9 = vld [vmem:[#allocation18_spill] sm:$0xff] }
 0x3b3   : > { %v1236_v15 = vmul.f32 %v1902_v54, %v2991_v9 }
 0x3b7   : > { %1326 = vmatpush.bf16.xpose.msrb.mxu0 %v1296_v18  ;;  %1339 = vmatpush.bf16.xpose.msrb.mxu1 %v1297_v41 }
 0x3ba   : > { %1147 = vadd.xlane.f32.xlu0 %v1146_v42  ;;  %383 = vperm.xlu2 %1752, %v370_v55  }
 0x3cd   : > { %v1184_v36 = vpop.xlane.xlu0 %1183 }
 0x3e5   : > { %v1187_v45 = vpop.xlane.xlu2 %1186 }
 0x3ed   : > { %v2797_v56 = vpop.xlane.xlu2 %1180 }
 0x3f5   : > { %v1190_v31 = vpop.xlane.xlu0 %1189  ;;  %v2799_v30 = vpop.xlane.xlu2 %1171 }
 0x3fd   : > { %v1178_v50 = vpop.xlane.xlu0 %1177  ;;  %v1109_v61 = vpop.xlane.xlu2 %1108 }
 0x405   : > { %v1112_v51 = vpop.xlane.xlu0 %1111  ;;  %v1193_v37 = vpop.xlane.xlu2 %1192 }
 0x406   : > { %1903 = vrcp.f32 %v1112_v51 }
 0x407   : > { %1905 = vrcp.f32 %v1109_v61  ;;  %v2994_v61 = vld [vmem:[#allocation21_spill] sm:$0xff] }
 0x408   : > { %1907 = vrcp.f32 %v1106_v25 }
 0x409   : > { %1909 = vrcp.f32 %v1193_v37 }
 0x40c   : > { %v1904_v2 = vpop.eup %1903 }
 0x40d   : > { %v2801_v44 = vpop.xlane.xlu0 %1174  ;;  %v1234_v52 = vmul.f32 %v1904_v2, %v2692_v22  ;;  %v1235_v11 = vmul.f32 %v1904_v2, %v2694_v6  ;;  %v1906_v24 = vpop.eup %1905  ;;  %v2993_v22 = vld [vmem:[#allocation20_spill] sm:$0xff] }
 0x40e   : > { %v1908_v18 = vpop.eup %1907  ;;  %v1232_v41 = vmul.f32 %v1906_v24, %v2670_v57  ;;  %v1233_v42 = vmul.f32 %v1906_v24, %v2672_v43  ;;  %v1100_v54 = vpop.xlane.xlu2 %1099 }
 0x40f   : > { %v1294_v32 = vpack.c.bf16 %v1236_v15, %v1234_v52  ;;  %v1295_v47 = vpack.c.bf16 %v1237_v12, %v1235_v11  ;;  %v1230_v46 = vmul.f32 %v1908_v18, %v2993_v22  ;;  %v1231_v51 = vmul.f32 %v1908_v18, %v2994_v61  ;;  %v1910_v52 = vpop.eup %1909 }
 0x410   : > { %1911 = vrcp.f32 %v1100_v54  ;;  %v1288_v11 = vmul.f32 %v1910_v52, %v2696_v3  ;;  %v1289_v38 = vmul.f32 %v1910_v52, %v2700_v20 }
 0x411   : > { %1327 = vmatpush.bf16.xpose.msrb.mxu0 %v1294_v32  ;;  %1340 = vmatpush.bf16.xpose.msrb.mxu1 %v1295_v47  ;;  %v1292_v6 = vpack.c.bf16 %v1232_v41, %v1230_v46  ;;  %v1293_v25 = vpack.c.bf16 %v1233_v42, %v1231_v51  ;;  %1913 = vrcp.f32 %v1190_v31 }
 0x415   : > { %v2809_v55 = vpop.xlane.xlu0 %1165 }
 0x416   : > { %v1912_v57 = vpop.eup %1911  ;;  %v2813_v43 = vpop.xlane.xlu2 %1162 }
 0x417   : > { %v1914_v9 = vpop.eup %1913  ;;  %v1226_v12 = vmul.f32 %v1912_v57, %v2713_v1  ;;  %v1227_v31 = vmul.f32 %v1912_v57, %v2715_v13 }
 0x418   : > { %v1286_v47 = vmul.f32 %v1914_v9, %v2660_v53  ;;  %v419_v53 = vpop.f32.mrf.mxu0 }
 0x419   : > { %1328 = vmatpush.bf16.xpose.msrb.mxu0 %v1292_v6  ;;  %1341 = vmatpush.bf16.xpose.msrb.mxu1 %v1293_v25 }
 0x41a   : > { %v1320_v41 = vpack.c.bf16 %v1288_v11, %v1286_v47 }
 0x41d   : > { %v1103_v2 = vpop.xlane.xlu0 %1102 }
 0x41e   : > { %1915 = vrcp.f32 %v1103_v2  ;;  %v384_v20 = vpop.permute.xlu2 %383 }
 0x41f   : > { %1917 = vrcp.f32 %v1187_v45  ;;  %v1287_v45 = vmul.f32 %v1914_v9, %v2663_v48  ;;  %v420_v22 = vadd.f32 %v419_v53, %v384_v20 }
 0x420   : > { %1919 = vrcp.f32 %v1184_v36 }
 0x421   : > { %v1321_v36 = vpack.c.bf16 %v1289_v38, %v1287_v45  ;;  %1921 = vrcp.f32 %v1178_v50  ;;  %v2828_v6 = vpack.c.bf16 %v420_v22, %v420_v22 }
 0x422   : > { %1923 = vrcp.f32 %v2797_v56 }
 0x423   : > { %1925 = vrcp.f32 %v2801_v44 }
 0x424   : > { %v1916_v15 = vpop.eup %1915  ;;  %1927 = vrcp.f32 %v2799_v30 }
 0x425   : > { %v1228_v37 = vmul.f32 %v1916_v15, %v2755_v40  ;;  %v1229_v32 = vmul.f32 %v1916_v15, %v2757_v60  ;;  %v1918_v42 = vpop.eup %1917  ;;  %v445_v60 = vpop.f32.mrf.mxu1  ;;  %1929 = vrcp.f32 %v2809_v55 }
 0x426   : > { %v1920_v3 = vpop.eup %1919  ;;  %v1284_v1 = vmul.f32 %v1918_v42, %v2624_v58  ;;  %v1285_v13 = vmul.f32 %v1918_v42, %v2628_v14  ;;  %v446_v46 = vadd.f32 %v445_v60, %v384_v20  ;;  %v2997_v60 = vld [vmem:[#allocation27_spill] sm:$0xff] }
 0x427   : > { %v1290_v24 = vpack.c.bf16 %v1228_v37, %v1226_v12  ;;  %v1291_v18 = vpack.c.bf16 %v1229_v32, %v1227_v31  ;;  %v1282_v48 = vmul.f32 %v1920_v3, %v2608_v62  ;;  %v1283_v40 = vmul.f32 %v1920_v3, %v2610_v16  ;;  %v1922_v50 = vpop.eup %1921  ;;  %v1169_v62 = vpop.xlane.xlu1 %1168  ;;  %v2995_v3 = vld [vmem:[#allocation25_spill] sm:$0xff] }
 0x428   : > { %v2830_v25 = vpack.c.bf16 %v446_v46, %v446_v46  ;;  %v1924_v58 = vpop.eup %1923  ;;  %v1278_v16 = vmul.f32 %v1922_v50, %v2678_v8  ;;  %v1279_v14 = vmul.f32 %v1922_v50, %v2680_v0  ;;  %1931 = vrcp.f32 %v1169_v62  ;;  %v1382_v50 = vld [vmem:[%s2082_s7] sm:$0xff]  ;;  %v1384_v62 = vld [vmem:[%s2082_s7 + $0x10] sm:$0xff] }
 0x429   : > { %1329 = vmatpush.bf16.xpose.msrb.mxu0 %v1290_v24  ;;  %1342 = vmatpush.bf16.xpose.msrb.mxu1 %v1291_v18  ;;  %v1318_v61 = vpack.c.bf16 %v1284_v1, %v1282_v48  ;;  %v1319_v51 = vpack.c.bf16 %v1285_v13, %v1283_v40  ;;  %v1280_v56 = vmul.f32 %v1924_v58, %v2636_v7  ;;  %v1926_v57 = vpop.eup %1925  ;;  %1933 = vrcp.f32 %v2813_v43  ;;  %v2996_v40 = vld [vmem:[#allocation26_spill] sm:$0xff] }
 0x42a   : > { %v1281_v54 = vmul.f32 %v1924_v58, %v2642_v59  ;;  %v1928_v44 = vpop.eup %1927  ;;  %v1276_v9 = vmul.f32 %v1926_v57, %v2721_v21  ;;  %v1277_v8 = vmul.f32 %v1926_v57, %v2723_v63  ;;  %v1154_v63 = vpop.xlane.xlu0 %1153  ;;  %v1383_v58 = vld [vmem:[%s2082_s7 + $0x8] sm:$0xff] }
 0x42b   : > { %v1316_v2 = vpack.c.bf16 %v1280_v56, %v1278_v16  ;;  %v1274_v30 = vmul.f32 %v1928_v44, %v2652_v10  ;;  %v1275_v7 = vmul.f32 %v1928_v44, %v2656_v35  ;;  %v1930_v11 = vpop.eup %1929  ;;  %v1385_v16 = vld [vmem:[%s2082_s7 + $0x18] sm:$0xff] }
 0x42c   : > { %v1317_v52 = vpack.c.bf16 %v1281_v54, %v1279_v14  ;;  %v1270_v55 = vmul.f32 %v1930_v11, %v2735_v27  ;;  %v1271_v21 = vmul.f32 %v1930_v11, %v2737_v23  ;;  %v1376_v44 = vld [vmem:[#allocation2 + $0x18] sm:$0xff] }
 0x42d   : > { %v1314_v15 = vpack.c.bf16 %v1276_v9, %v1274_v30  ;;  %v1315_v59 = vpack.c.bf16 %v1277_v8, %v1275_v7 }
 0x42e   : > { %v1932_v38 = vpop.eup %1931 }
 0x42f   : > { %v1160_v0 = vpop.xlane.xlu1 %1159  ;;  %v1272_v12 = vmul.f32 %v1932_v38, %v2554_v49  ;;  %v1273_v10 = vmul.f32 %v1932_v38, %v2557_v4  ;;  %v1934_v32 = vpop.eup %1933  ;;  %v1375_v38 = vld [vmem:[#allocation2] sm:$0xff] }
 0x430   : > { %1330 = vmatmul.bf16.vlgmr.msrb.gmra.mxu0 %v2828_v6  ;;  %1343 = vmatmul.bf16.vlgmr.msrb.gmra.mxu1 %v2830_v25  ;;  %1935 = vrcp.f32 %v1160_v0  ;;  %v1268_v43 = vmul.f32 %v1934_v32, %v2741_v28  ;;  %v1269_v27 = vmul.f32 %v1934_v32, %v2743_v17  ;;  %v1378_v0 = vld [vmem:[#allocation2 + $0x8] sm:$0xff]  ;;  %v1381_v32 = vld [vmem:[#allocation2 + $0x38] sm:$0xff] }
 0x431   : > { %1348 = vmatpush.bf16.xpose.msra.mxu0 %v1320_v41  ;;  %1361 = vmatpush.bf16.xpose.msra.mxu1 %v1321_v36  ;;  %v1312_v35 = vpack.c.bf16 %v1272_v12, %v1270_v55  ;;  %v1313_v31 = vpack.c.bf16 %v1273_v10, %v1271_v21  ;;  %1937 = vrcp.f32 %v1154_v63  ;;  %v1377_v63 = vld [vmem:[#allocation2 + $0x10] sm:$0xff] }
 0x432   : > { %v1148_v49 = vpop.xlane.xlu0 %1147 }
 0x436   : > { %v1936_v47 = vpop.eup %1935 }
 0x437   : > { %v1157_v37 = vpop.xlane.xlu1 %1156  ;;  %v1266_v23 = vmul.f32 %v1936_v47, %v2564_v39  ;;  %v1267_v45 = vmul.f32 %v1936_v47, %v2566_v19  ;;  %v1938_v18 = vpop.eup %1937 }
 0x438   : > { %1939 = vrcp.f32 %v1157_v37  ;;  %v1262_v42 = vmul.f32 %v1938_v18, %v2777_v5  ;;  %v1263_v28 = vmul.f32 %v1938_v18, %v2779_v33  ;;  %v1379_v37 = vld [vmem:[#allocation2 + $0x20] sm:$0xff] }
 0x439   : > { %1349 = vmatpush.bf16.xpose.msra.mxu0 %v1318_v61  ;;  %1362 = vmatpush.bf16.xpose.msra.mxu1 %v1319_v51  ;;  %v1310_v24 = vpack.c.bf16 %v1268_v43, %v1266_v23  ;;  %v1311_v4 = vpack.c.bf16 %v1269_v27, %v1267_v45  ;;  %1941 = vrcp.f32 %v1148_v49 }
 0x43e   : > { %v1940_v36 = vpop.eup %1939 }
 0x43f   : > { %v1151_v41 = vpop.xlane.xlu1 %1150  ;;  %v1264_v17 = vmul.f32 %v1940_v36, %v2574_v34  ;;  %v1265_v39 = vmul.f32 %v1940_v36, %v2995_v3  ;;  %v1942_v1 = vpop.eup %1941 }
 0x440   : > { %1943 = vrcp.f32 %v1151_v41  ;;  %v1258_v53 = vmul.f32 %v1942_v1, %v2790_v26  ;;  %v1259_v48 = vmul.f32 %v1942_v1, %v2792_v29 }
 0x441   : > { %1350 = vmatpush.bf16.xpose.msra.mxu0 %v1316_v2  ;;  %1363 = vmatpush.bf16.xpose.msra.mxu1 %v1317_v52  ;;  %v1308_v20 = vpack.c.bf16 %v1264_v17, %v1262_v42  ;;  %v1309_v19 = vpack.c.bf16 %v1265_v39, %v1263_v28  ;;  %v1374_v2 = vld [vmem:[#allocation2 + $0x30] sm:$0xff] }
 0x446   : > { %v1944_v13 = vpop.eup %1943 }
 0x447   : > { %v1260_v5 = vmul.f32 %v1944_v13, %v2996_v40  ;;  %v1261_v33 = vmul.f32 %v1944_v13, %v2997_v60 }
 0x449   : > { %1351 = vmatpush.bf16.xpose.msra.mxu0 %v1314_v15  ;;  %1364 = vmatpush.bf16.xpose.msra.mxu1 %v1315_v59  ;;  %v1306_v22 = vpack.c.bf16 %v1260_v5, %v1258_v53  ;;  %v1307_v34 = vpack.c.bf16 %v1261_v33, %v1259_v48  ;;  %v1380_v15 = vld [vmem:[#allocation2 + $0x28] sm:$0xff] }
 0x451   : > { %1352 = vmatpush.bf16.xpose.msra.mxu0 %v1312_v35  ;;  %1365 = vmatpush.bf16.xpose.msra.mxu1 %v1313_v31 }
 0x459   : > { %1353 = vmatpush.bf16.xpose.msra.mxu0 %v1310_v24  ;;  %1366 = vmatpush.bf16.xpose.msra.mxu1 %v1311_v4 }
 0x461   : > { %1354 = vmatpush.bf16.xpose.msra.mxu0 %v1308_v20  ;;  %1367 = vmatpush.bf16.xpose.msra.mxu1 %v1309_v19 }
 0x469   : > { %1355 = vmatpush.bf16.xpose.msra.mxu0 %v1306_v22  ;;  %1368 = vmatpush.bf16.xpose.msra.mxu1 %v1307_v34 }
 0x470   : > { %1356 = vmatmul.bf16.vlgmr.msra.gmra.mxu0 %v2828_v6  ;;  %1369 = vmatmul.bf16.vlgmr.msra.gmra.mxu1 %v2830_v25 }
 0x4ad   : > { %v1331_v46 = vpop.f32.mrf.mxu0  ;;  %v1344_v26 = vpop.f32.mrf.mxu1 }
 0x4ae   : > { %v1345_v61 = vadd.f32 %v1344_v26, %v1331_v46 }
 0x4b0   : > { %1413 = vmatpush.msrb.mxu0 %v1345_v61 }
 0x4b1   : > { %1692 = vmatmul.msk.f32.vlgmr.msrb.gmra.mxu0 %vm576_vm2, %v1382_v50 }
 0x4b5   : > { %v1333_v29 = vpop.f32.mrf.mxu0  ;;  %v1346_v51 = vpop.f32.mrf.mxu1 }
 0x4b9   : > { %1693 = vmatmul.msk.f32.gmra.mxu0 %vm576_vm2, %v1383_v58 }
 0x4c1   : > { %1694 = vmatmul.msk.f32.gmra.mxu0 %vm576_vm2, %v1384_v62 }
 0x4c9   : > { %1695 = vmatmul.msk.f32.gmra.mxu0 %vm576_vm2, %v1385_v16 }
 0x4ed   : > { %v1357_v6 = vpop.f32.mrf.mxu0  ;;  %v1370_v25 = vpop.f32.mrf.mxu1 }
 0x4ee   : > { %v1371_v14 = vadd.f32 %v1370_v25, %v1357_v6 }
 0x4f0   : > { %1442 = vmatpush.msrb.mxu1 %v1371_v14 }
 0x4f1   : > { %1696 = vmatmul.msk.f32.vlgmr.msrb.gmra.mxu1 %vm576_vm2, %v1382_v50 }
 0x4f5   : > { %v1359_v56 = vpop.f32.mrf.mxu0  ;;  %v1372_v54 = vpop.f32.mrf.mxu1 }
 0x4f9   : > { %1697 = vmatmul.msk.f32.gmra.mxu1 %vm576_vm2, %v1383_v58 }
 0x501   : > { %1698 = vmatmul.msk.f32.gmra.mxu1 %vm576_vm2, %v1384_v62 }
 0x509   : > { %1699 = vmatmul.msk.f32.gmra.mxu1 %vm576_vm2, %v1385_v16 }
 0x52e   : > { %v1415_v52 = vpop.f32.mrf.mxu0 }
 0x52f   : > { %v1456_v57 = vadd.f32 %v1415_v52, %v1374_v2 }
 0x531   : > { %1464 = vst [vmem:[#allocation2 + $0x30] sm:$0xff] %v1456_v57 }
 0x536   : > { %v1418_v9 = vpop.f32.mrf.mxu0 }
 0x537   : > { %v1458_v8 = vadd.f32 %v1418_v9, %v1376_v44 }
 0x539   : > { %1466 = vst [vmem:[#allocation2 + $0x18] sm:$0xff] %v1458_v8 }
 0x53e   : > { %v1421_v30 = vpop.f32.mrf.mxu0 }
 0x53f   : > { %v1460_v7 = vadd.f32 %v1421_v30, %v1378_v0 }
 0x541   : > { %1468 = vst [vmem:[#allocation2 + $0x8] sm:$0xff] %v1460_v7 }
 0x546   : > { %v1424_v59 = vpop.f32.mrf.mxu0 }
 0x547   : > { %v1462_v11 = vadd.f32 %v1424_v59, %v1380_v15 }
 0x549   : > { %1470 = vst [vmem:[#allocation2 + $0x28] sm:$0xff] %v1462_v11 }
 0x56e   : > { %v1444_v55 = vpop.f32.mrf.mxu1 }
 0x56f   : > { %v1457_v21 = vadd.f32 %v1444_v55, %v1375_v38 }
 0x571   : > { %1465 = vst [vmem:[#allocation2] sm:$0xff] %v1457_v21 }
 0x576   : > { %v1447_v12 = vpop.f32.mrf.mxu1 }
 0x577   : > { %v1459_v10 = vadd.f32 %v1447_v12, %v1377_v63 }
 0x579   : > { %1467 = vst [vmem:[#allocation2 + $0x10] sm:$0xff] %v1459_v10 }
 0x57e   : > { %v1450_v35 = vpop.f32.mrf.mxu1 }
 0x57f   : > { %v1461_v31 = vadd.f32 %v1450_v35, %v1379_v37 }
 0x581   : > { %1469 = vst [vmem:[#allocation2 + $0x20] sm:$0xff] %v1461_v31 }
 0x585   : > { %1475 = sbr.rel (%p1700_p8) target bundleno = 1549 (0x60d), region = 52 }
 0x586   : > { %v1453_v47 = vpop.f32.mrf.mxu1 }
 0x587   : > { %v1463_v43 = vadd.f32 %v1453_v47, %v1381_v32 }
 0x589   : > { %1471 = vst [vmem:[#allocation2 + $0x38] sm:$0xff] %v1463_v43 }
 0x58a   : > { %v1486_v27 = vld [vmem:[%s2917_s5 + $0x10] sm:$0xff]  ;;  %v1484_v23 = vld [vmem:[%s2917_s5] sm:$0xff]  ;;  %v1989_v45 = vmov 0   ;;  %v1487_v49 = vld [vmem:[%s2917_s5 + $0x18] sm:$0xff] }
 0x58b   : > { %1946 = vset.pattern.permute.xlu1 %v1989_v45  ;;  %1945 = vset.pattern.permute.xlu0 %v1989_v45  ;;  %v1485_v24 = vld [vmem:[%s2917_s5 + $0x8] sm:$0xff]  ;;  %v1481_v18 = vld [vmem:[#allocation2 + $0x20] sm:$0xff]  ;;  %v1476_v41 = vld [vmem:[#allocation2 + $0x30] sm:$0xff] }
 0x58c   : > { %1500 = vperm.xlu1 %1946, %v1486_v27   ;;  %1490 = vperm.xlu0 %1945, %v1484_v23   ;;  %v1480_v4 = vld [vmem:[#allocation2 + $0x8] sm:$0xff]  ;;  %v1477_v36 = vld [vmem:[#allocation2] sm:$0xff]  ;;  %v1478_v13 = vld [vmem:[#allocation2 + $0x18] sm:$0xff] }
 0x58d   : > { %v1482_v19 = vld [vmem:[#allocation2 + $0x28] sm:$0xff]  ;;  %v1479_v53 = vld [vmem:[#allocation2 + $0x10] sm:$0xff] }
 0x590   : > { %v1483_v1 = vld [vmem:[#allocation2 + $0x38] sm:$0xff] }
 0x594   : > { %1505 = vperm.xlu1 %1946, %v1487_v49   ;;  %1495 = vperm.xlu0 %1945, %v1485_v24  }
 0x5fe   : > { %v1501_v42 = vpop.permute.xlu1 %1500  ;;  %v1491_v28 = vpop.permute.xlu0 %1490 }
 0x5ff   : > { %v1512_v17 = vadd.f32 %v1501_v42, %v1480_v4  ;;  %v1513_v3 = vadd.f32 %v1501_v42, %v1481_v18  ;;  %v1508_v39 = vadd.f32 %v1491_v28, %v1476_v41  ;;  %v1509_v20 = vadd.f32 %v1491_v28, %v1477_v36 }
 0x601   : > { %1520 = vst [vmem:[%s2087_s12 + $0x20] sm:$0xff] %v1512_v17 }
 0x602   : > { %1521 = vst [vmem:[%s2087_s12 + $0x28] sm:$0xff] %v1513_v3 }
 0x603   : > { %1516 = vst [vmem:[%s2087_s12] sm:$0xff] %v1508_v39 }
 0x604   : > { %1517 = vst [vmem:[%s2087_s12 + $0x8] sm:$0xff] %v1509_v20 }
 0x606   : > { %v1506_v48 = vpop.permute.xlu1 %1505  ;;  %v1496_v40 = vpop.permute.xlu0 %1495 }
 0x607   : > { %v1514_v5 = vadd.f32 %v1506_v48, %v1482_v19  ;;  %v1515_v60 = vadd.f32 %v1506_v48, %v1483_v1  ;;  %v1510_v33 = vadd.f32 %v1496_v40, %v1478_v13  ;;  %v1511_v22 = vadd.f32 %v1496_v40, %v1479_v53 }
 0x609   : > { %1522 = vst [vmem:[%s2087_s12 + $0x30] sm:$0xff] %v1514_v5 }
 0x60a   : > { %1523 = vst [vmem:[%s2087_s12 + $0x38] sm:$0xff] %v1515_v60 }
 0x60b   : > { %1518 = vst [vmem:[%s2087_s12 + $0x10] sm:$0xff] %v1510_v33 }
 0x60c   : > { %1519 = vst [vmem:[%s2087_s12 + $0x18] sm:$0xff] %v1511_v22 }
 0x60d PF: > { %s16_s25 = sadd.s32 1, %s1985_s25   ;;  %s2998_s21 = smov %s1977_s23 }
 0x60e   : > { %p13_p9 = scmp.ge.s32.totalorder %s16_s25, 10   ;;  %s2999_s22 = smov %s1981_s24 }
 0x60f   : > { %s3000_s23 = smov %s3003_s26  ;;  %s3001_s24 = smov %s3007_s27 }
 0x610   :  { %15 = sbr.rel (!%p13_p9) target bundleno = 3 (0x3), region = 94 }

</bundles_post_ra>
